<compile_context>
chip_gen: v5e
topology: v5e:2x2
jax: 0.10.0
libtpu: 0.0.40
codegen_flags: <defaults>
</compile_context>

<pallas_src>
import functools

import jax
import jax.numpy as jnp
from jax import lax
from jax.experimental import pallas as pl
from jax.experimental.pallas import tpu as pltpu


def _cwsa_kernel(x_ref, wqkv_ref, bqkv_ref, wproj_ref, bproj_ref,
                 temp_ref, bias_ref, o_ref, qkv_ref, *, num_heads, head_dim):
    """Fully fused per-batch CW-SA forward.

    x_ref:     (N, C)        VMEM
    wqkv_ref:  (C, 3C)       VMEM
    bqkv_ref:  (1, 3C)       VMEM
    wproj_ref: (C, C)        VMEM
    bproj_ref: (1, C)        VMEM
    temp_ref:  (1, C)        VMEM  (temperature repeated per head_dim)
    bias_ref:  (C, C)        VMEM  (0 on head blocks, -1e30 off-block)
    o_ref:     (N, C)        VMEM  (projected output, torch row order)
    qkv_ref:   (N, 3C)       VMEM scratch
    """
    C = num_heads * head_dim
    N = x_ref.shape[0]
    M = N // num_heads

    # ---- qkv projection (one MXU matmul), staged through VMEM scratch ----
    qkv_ref[...] = (jnp.dot(x_ref[...], wqkv_ref[...],
                            preferred_element_type=jnp.float32)
                    + bqkv_ref[...])
    q = qkv_ref[:, 0:C]
    k = qkv_ref[:, C:2 * C]
    v = qkv_ref[:, 2 * C:3 * C]

    # ---- F.normalize(q.transpose(-2,-1), dim=-1): per-channel L2 over N ----
    # 1/max(||q||, eps) == rsqrt(max(sum q^2, eps^2)), eps = 1e-12.
    qn = q * lax.rsqrt(jnp.maximum(jnp.sum(q * q, axis=0, keepdims=True), 1e-24))
    kn = k * lax.rsqrt(jnp.maximum(jnp.sum(k * k, axis=0, keepdims=True), 1e-24))

    # ---- block-diagonal channel attention in ONE (C, C) Gram matmul ----
    # gram[d, e] = sum_n qn[n, d] * kn[n, e]
    gram = lax.dot_general(qn, kn, (((0,), (0,)), ((), ())),
                           preferred_element_type=jnp.float32)
    attn = gram * temp_ref[...] + bias_ref[...]          # temp per column + mask
    attn = attn - jnp.max(attn, axis=-1, keepdims=True)  # stable softmax (rows)
    attn = jnp.exp(attn)                                 # off-block -> exactly 0
    attn = attn * pl.reciprocal(jnp.sum(attn, axis=-1, keepdims=True), approx=False)
    # attn_drop: p = 0.0 -> identity.

    # ---- attention output, natural (token, channel) layout ----
    # a[n, c] = sum_e v[n, e] * attn[c, e]   == torch out.transpose(-2,-1) per head
    a = lax.dot_general(v, attn, (((1,), (1,)), ((), ())),
                        preferred_element_type=jnp.float32)          # (N, C)

    # ---- torch's `out.transpose(-2,-1).reshape(B, N, C)` interleave ----
    # (done in VMEM with only leading-dim-split / merge-last-dims reshapes)
    a3 = jnp.reshape(a, (M, num_heads, C))                           # split rows
    bt = jnp.concatenate(
        [jnp.reshape(a3[:, :, h * head_dim:(h + 1) * head_dim], (M, C))
         for h in range(num_heads)], axis=0)                         # (N, C)

    # ---- fused output projection, lane-dense (N, C) store ----
    o_ref[...] = (jnp.dot(bt, wproj_ref[...], preferred_element_type=jnp.float32)
                  + bproj_ref[...]).astype(o_ref.dtype)


def channel_wise_self_attention(x, wqkv, bqkv, wproj, bproj, temperature, num_heads):
    """x: (B, C, H, W) float32 -> (B, C, H, W) float32."""
    B, C, H, W = x.shape
    N = H * W
    hd = C // num_heads
    assert C % num_heads == 0
    if N % num_heads != 0:
        # TODO(synk): the in-kernel torch-reshape interleave assumes N % num_heads == 0.
        raise NotImplementedError("H*W must be divisible by num_heads")

    # glue: NCHW -> (B, N, C)   (== x.flatten(2).transpose(1, 2))
    x_flat = jnp.transpose(jnp.reshape(x, (B, C, N)), (0, 2, 1))

    # per-column temperature (repeated per head_dim) and block-diagonal mask
    temp_row = jnp.reshape(
        jnp.repeat(jnp.reshape(temperature, (num_heads,)).astype(jnp.float32), hd),
        (1, C))
    head_id = jnp.arange(C, dtype=jnp.int32) // hd
    attn_bias = jnp.where(head_id[:, None] == head_id[None, :],
                          0.0, -1e30).astype(jnp.float32)

    kernel = functools.partial(_cwsa_kernel, num_heads=num_heads, head_dim=hd)

    flops = 12 * B * N * C * C                    # qkv(6) + gram(2) + av(2) + proj(2)
    bytes_accessed = 4 * (2 * B * N * C + 5 * C * C + 6 * C)
    cost = pl.CostEstimate(flops=flops, transcendentals=B * C * C,
                           bytes_accessed=bytes_accessed)

    out_flat = pl.pallas_call(
        kernel,
        grid=(B,),
        in_specs=[
            pl.BlockSpec((None, N, C), lambda b: (b, 0, 0)),      # x
            pl.BlockSpec((C, 3 * C), lambda b: (0, 0)),           # wqkv
            pl.BlockSpec((1, 3 * C), lambda b: (0, 0)),           # bqkv
            pl.BlockSpec((C, C), lambda b: (0, 0)),               # wproj
            pl.BlockSpec((1, C), lambda b: (0, 0)),               # bproj
            pl.BlockSpec((1, C), lambda b: (0, 0)),               # temperature
            pl.BlockSpec((C, C), lambda b: (0, 0)),               # mask bias
        ],
        out_specs=pl.BlockSpec((None, N, C), lambda b: (b, 0, 0)),
        out_shape=jax.ShapeDtypeStruct((B, N, C), jnp.float32),
        scratch_shapes=[pltpu.VMEM((N, 3 * C), jnp.float32)],
        compiler_params=pltpu.CompilerParams(
            dimension_semantics=("parallel",),
            vmem_limit_bytes=32 * 1024 * 1024),
        cost_estimate=cost,
    )(x_flat, wqkv, jnp.reshape(bqkv, (1, 3 * C)), wproj,
      jnp.reshape(bproj, (1, C)), temp_row, attn_bias)

    # glue: (B, N, C) -> (B, C, H, W)  (== out.transpose(1, 2).view(B, C, H, W))
    return jnp.reshape(jnp.transpose(out_flat, (0, 2, 1)), (B, C, H, W))


def reference(x, wqkv, bqkv, wproj, bproj, temperature, num_heads):
    """Pure-JAX mirror of the PyTorch forward (for verification)."""
    B, C, H, W = x.shape
    N = H * W
    hd = C // num_heads
    x_flat = jnp.transpose(jnp.reshape(x, (B, C, N)), (0, 2, 1))
    qkv = x_flat @ wqkv + bqkv
    qkv = jnp.transpose(jnp.reshape(qkv, (B, N, 3, num_heads, hd)), (2, 0, 3, 1, 4))
    q, k, v = qkv[0], qkv[1], qkv[2]
    q = jnp.swapaxes(q, -2, -1)
    k = jnp.swapaxes(k, -2, -1)
    v = jnp.swapaxes(v, -2, -1)
    qn = q / jnp.maximum(jnp.linalg.norm(q, axis=-1, keepdims=True), 1e-12)
    kn = k / jnp.maximum(jnp.linalg.norm(k, axis=-1, keepdims=True), 1e-12)
    attn = (qn @ jnp.swapaxes(kn, -2, -1)) * jnp.reshape(temperature, (1, num_heads, 1, 1))
    attn = jax.nn.softmax(attn, axis=-1)
    out = attn @ v
    out = jnp.reshape(jnp.swapaxes(out, -2, -1), (B, N, C))
    out = out @ wproj + bproj
    return jnp.reshape(jnp.transpose(out, (0, 2, 1)), (B, C, H, W))


if __name__ == "__main__":
    B, C, H, W = 2, 32, 8, 8
    num_heads = 4

    key = jax.random.PRNGKey(0)
    k1, k2, k3, k4, k5 = jax.random.split(key, 5)
    x = jax.random.normal(k1, (B, C, H, W), jnp.float32)

    # Deterministic synthetic parameters (nn.Linear weights stored pre-transposed).
    wqkv = jax.random.normal(k2, (C, 3 * C), jnp.float32) * (C ** -0.5)
    bqkv = jax.random.normal(k3, (3 * C,), jnp.float32) * 0.02
    wproj = jax.random.normal(k4, (C, C), jnp.float32) * (C ** -0.5)
    bproj = jax.random.normal(k5, (C,), jnp.float32) * 0.02
    temperature = jnp.ones((num_heads,), jnp.float32)  # nn.Parameter(torch.ones(h,1,1))

    out = channel_wise_self_attention(x, wqkv, bqkv, wproj, bproj, temperature, num_heads)
    out = jax.block_until_ready(out)

    with jax.default_matmul_precision("highest"):
        ref = jax.block_until_ready(
            reference(x, wqkv, bqkv, wproj, bproj, temperature, num_heads))

    assert out.shape == (B, C, H, W), out.shape
    if not jnp.allclose(out, ref, atol=1e-3, rtol=1e-3):
        max_err = float(jnp.max(jnp.abs(out - ref)))
        raise AssertionError(f"Pallas kernel mismatch vs reference, max abs err={max_err}")

    print("KERNEL_OK")
</pallas_src>

<mosaic_0001>
module attributes {stable_mosaic.version = 11 : i64} {
  func.func @_cwsa_kernel(%arg0: i32, %arg1: memref<1x64x32xf32, #tpu.memory_space<vmem>>, %arg2: memref<32x96xf32, #tpu.memory_space<vmem>>, %arg3: memref<1x96xf32, #tpu.memory_space<vmem>>, %arg4: memref<32x32xf32, #tpu.memory_space<vmem>>, %arg5: memref<1x32xf32, #tpu.memory_space<vmem>>, %arg6: memref<1x32xf32, #tpu.memory_space<vmem>>, %arg7: memref<32x32xf32, #tpu.memory_space<vmem>>, %arg8: memref<1x64x32xf32, #tpu.memory_space<vmem>>, %arg9: memref<64x96xf32, #tpu.memory_space<vmem>>) attributes {dimension_semantics = [#tpu.dimension_semantics<parallel>], iteration_bounds = array<i64: 2>, scalar_prefetch = 0 : i64, scratch_operands = 1 : i64, tpu.core_type = #tpu.core_type<tc>, window_params = [{transform_indices = @transform_0, window_bounds = array<i64: 1, 64, 32>}, {pipeline_mode = #tpu.pipeline_mode<synchronous>, transform_indices = @transform_1, window_bounds = array<i64: 32, 96>}, {pipeline_mode = #tpu.pipeline_mode<synchronous>, transform_indices = @transform_2, window_bounds = array<i64: 1, 96>}, {pipeline_mode = #tpu.pipeline_mode<synchronous>, transform_indices = @transform_3, window_bounds = array<i64: 32, 32>}, {pipeline_mode = #tpu.pipeline_mode<synchronous>, transform_indices = @transform_4, window_bounds = array<i64: 1, 32>}, {pipeline_mode = #tpu.pipeline_mode<synchronous>, transform_indices = @transform_5, window_bounds = array<i64: 1, 32>}, {pipeline_mode = #tpu.pipeline_mode<synchronous>, transform_indices = @transform_6, window_bounds = array<i64: 32, 32>}, {transform_indices = @transform_7, window_bounds = array<i64: 1, 64, 32>}]} {
    %c0 = arith.constant 0 : index
    %c0_0 = arith.constant 0 : index
    %c0_1 = arith.constant 0 : index
    %0 = vector.load %arg1[%c0, %c0_0, %c0_1] : memref<1x64x32xf32, #tpu.memory_space<vmem>>, vector<1x64x32xf32>
    %1 = vector.shape_cast %0 : vector<1x64x32xf32> to vector<64x32xf32>
    %c0_2 = arith.constant 0 : index
    %c0_3 = arith.constant 0 : index
    %2 = vector.load %arg2[%c0_2, %c0_3] : memref<32x96xf32, #tpu.memory_space<vmem>>, vector<32x96xf32>
    %cst = arith.constant dense<0.000000e+00> : vector<64x96xf32>
    %3 = tpu.matmul %1, %2, %cst {dimension_numbers = #tpu.dot_dimension_numbers<[1], [0], [0], [1], [0, 0, 1, 1], [], []>} : vector<64x32xf32>, vector<32x96xf32>, vector<64x96xf32> -> vector<64x96xf32>
    %c0_4 = arith.constant 0 : index
    %c0_5 = arith.constant 0 : index
    %4 = vector.load %arg3[%c0_4, %c0_5] : memref<1x96xf32, #tpu.memory_space<vmem>>, vector<1x96xf32>
    %5 = vector.broadcast %4 : vector<1x96xf32> to vector<64x96xf32>
    %6 = arith.addf %3, %5 : vector<64x96xf32>
    %c0_6 = arith.constant 0 : index
    %c0_7 = arith.constant 0 : index
    %7 = vector.load %arg9[%c0_6, %c0_7] : memref<64x96xf32, #tpu.memory_space<vmem>>, vector<64x96xf32>
    tpu.vector_store %arg9[%c0_6, %c0_7], %6 {strides = array<i32>} : memref<64x96xf32, #tpu.memory_space<vmem>>, vector<64x96xf32>,
    %c0_8 = arith.constant 0 : index
    %c0_9 = arith.constant 0 : index
    %8 = vector.load %arg9[%c0_8, %c0_9] : memref<64x96xf32, #tpu.memory_space<vmem>>, vector<64x32xf32>
    %c0_10 = arith.constant 0 : index
    %c32 = arith.constant 32 : index
    %9 = vector.load %arg9[%c0_10, %c32] : memref<64x96xf32, #tpu.memory_space<vmem>>, vector<64x32xf32>
    %c0_11 = arith.constant 0 : index
    %c64 = arith.constant 64 : index
    %10 = vector.load %arg9[%c0_11, %c64] : memref<64x96xf32, #tpu.memory_space<vmem>>, vector<64x32xf32>
    %11 = arith.mulf %8, %8 : vector<64x32xf32>
    %cst_12 = arith.constant dense<0.000000e+00> : vector<32xf32>
    %12 = vector.multi_reduction <add>, %11, %cst_12 [0] : vector<64x32xf32> to vector<32xf32>
    %13 = vector.shape_cast %12 : vector<32xf32> to vector<1x32xf32>
    %cst_13 = arith.constant 1.000000e-24 : f32
    %14 = vector.broadcast %cst_13 : f32 to vector<1x32xf32>
    %15 = arith.maximumf %13, %14 : vector<1x32xf32>
    %16 = math.rsqrt %15 : vector<1x32xf32>
    %17 = vector.broadcast %16 : vector<1x32xf32> to vector<64x32xf32>
    %18 = arith.mulf %8, %17 : vector<64x32xf32>
    %19 = arith.mulf %9, %9 : vector<64x32xf32>
    %cst_14 = arith.constant dense<0.000000e+00> : vector<32xf32>
    %20 = vector.multi_reduction <add>, %19, %cst_14 [0] : vector<64x32xf32> to vector<32xf32>
    %21 = vector.shape_cast %20 : vector<32xf32> to vector<1x32xf32>
    %cst_15 = arith.constant 1.000000e-24 : f32
    %22 = vector.broadcast %cst_15 : f32 to vector<1x32xf32>
    %23 = arith.maximumf %21, %22 : vector<1x32xf32>
    %24 = math.rsqrt %23 : vector<1x32xf32>
    %25 = vector.broadcast %24 : vector<1x32xf32> to vector<64x32xf32>
    %26 = arith.mulf %9, %25 : vector<64x32xf32>
    %cst_16 = arith.constant dense<0.000000e+00> : vector<32x32xf32>
    %27 = tpu.matmul %18, %26, %cst_16 {dimension_numbers = #tpu.dot_dimension_numbers<[0], [0], [1], [1], [0, 1, 1, 1], [], []>} : vector<64x32xf32>, vector<64x32xf32>, vector<32x32xf32> -> vector<32x32xf32>
    %c0_17 = arith.constant 0 : index
    %c0_18 = arith.constant 0 : index
    %28 = vector.load %arg6[%c0_17, %c0_18] : memref<1x32xf32, #tpu.memory_space<vmem>>, vector<1x32xf32>
    %29 = vector.broadcast %28 : vector<1x32xf32> to vector<32x32xf32>
    %30 = arith.mulf %27, %29 : vector<32x32xf32>
    %c0_19 = arith.constant 0 : index
    %c0_20 = arith.constant 0 : index
    %31 = vector.load %arg7[%c0_19, %c0_20] : memref<32x32xf32, #tpu.memory_space<vmem>>, vector<32x32xf32>
    %32 = arith.addf %30, %31 : vector<32x32xf32>
    %cst_21 = arith.constant dense<0xFF800000> : vector<32xf32>
    %33 = vector.multi_reduction <maximumf>, %32, %cst_21 [1] : vector<32x32xf32> to vector<32xf32>
    %34 = vector.shape_cast %33 : vector<32xf32> to vector<32x1xf32>
    %35 = vector.broadcast %34 : vector<32x1xf32> to vector<32x32xf32>
    %36 = arith.subf %32, %35 : vector<32x32xf32>
    %37 = math.exp %36 : vector<32x32xf32>
    %cst_22 = arith.constant dense<0.000000e+00> : vector<32xf32>
    %38 = vector.multi_reduction <add>, %37, %cst_22 [1] : vector<32x32xf32> to vector<32xf32>
    %39 = vector.shape_cast %38 : vector<32xf32> to vector<32x1xf32>
    %40 = tpu.reciprocal %39 : vector<32x1xf32> -> vector<32x1xf32>
    %41 = vector.broadcast %40 : vector<32x1xf32> to vector<32x32xf32>
    %42 = arith.mulf %37, %41 : vector<32x32xf32>
    %cst_23 = arith.constant dense<0.000000e+00> : vector<64x32xf32>
    %43 = tpu.matmul %10, %42, %cst_23 {dimension_numbers = #tpu.dot_dimension_numbers<[1], [1], [0], [0], [0, 0, 1, 0], [], []>} : vector<64x32xf32>, vector<32x32xf32>, vector<64x32xf32> -> vector<64x32xf32>
    %44 = vector.shape_cast %43 : vector<64x32xf32> to vector<16x4x32xf32>
    %45 = vector.extract_strided_slice %44 {offsets = [0, 0, 0], sizes = [16, 4, 8], strides = [1, 1, 1]} : vector<16x4x32xf32> to vector<16x4x8xf32>
    %46 = vector.shape_cast %45 : vector<16x4x8xf32> to vector<16x32xf32>
    %47 = vector.extract_strided_slice %44 {offsets = [0, 0, 8], sizes = [16, 4, 8], strides = [1, 1, 1]} : vector<16x4x32xf32> to vector<16x4x8xf32>
    %48 = vector.shape_cast %47 : vector<16x4x8xf32> to vector<16x32xf32>
    %49 = vector.extract_strided_slice %44 {offsets = [0, 0, 16], sizes = [16, 4, 8], strides = [1, 1, 1]} : vector<16x4x32xf32> to vector<16x4x8xf32>
    %50 = vector.shape_cast %49 : vector<16x4x8xf32> to vector<16x32xf32>
    %51 = vector.extract_strided_slice %44 {offsets = [0, 0, 24], sizes = [16, 4, 8], strides = [1, 1, 1]} : vector<16x4x32xf32> to vector<16x4x8xf32>
    %52 = vector.shape_cast %51 : vector<16x4x8xf32> to vector<16x32xf32>
    %53 = tpu.concatenate %46, %48, %50, %52 in 0 : vector<16x32xf32>, vector<16x32xf32>, vector<16x32xf32>, vector<16x32xf32> -> vector<64x32xf32>
    %c0_24 = arith.constant 0 : index
    %c0_25 = arith.constant 0 : index
    %54 = vector.load %arg4[%c0_24, %c0_25] : memref<32x32xf32, #tpu.memory_space<vmem>>, vector<32x32xf32>
    %cst_26 = arith.constant dense<0.000000e+00> : vector<64x32xf32>
    %55 = tpu.matmul %53, %54, %cst_26 {dimension_numbers = #tpu.dot_dimension_numbers<[1], [0], [0], [1], [0, 0, 1, 1], [], []>} : vector<64x32xf32>, vector<32x32xf32>, vector<64x32xf32> -> vector<64x32xf32>
    %c0_27 = arith.constant 0 : index
    %c0_28 = arith.constant 0 : index
    %56 = vector.load %arg5[%c0_27, %c0_28] : memref<1x32xf32, #tpu.memory_space<vmem>>, vector<1x32xf32>
    %57 = vector.broadcast %56 : vector<1x32xf32> to vector<64x32xf32>
    %58 = arith.addf %55, %57 : vector<64x32xf32>
    %c0_29 = arith.constant 0 : index
    %c0_30 = arith.constant 0 : index
    %c0_31 = arith.constant 0 : index
    %59 = vector.load %arg8[%c0_29, %c0_30, %c0_31] : memref<1x64x32xf32, #tpu.memory_space<vmem>>, vector<1x64x32xf32>
    %60 = vector.shape_cast %59 : vector<1x64x32xf32> to vector<64x32xf32>
    %61 = vector.shape_cast %58 : vector<64x32xf32> to vector<1x64x32xf32>
    tpu.vector_store %arg8[%c0_29, %c0_30, %c0_31], %61 {strides = array<i32>} : memref<1x64x32xf32, #tpu.memory_space<vmem>>, vector<1x64x32xf32>,
    return
  }
  func.func @transform_0(%arg0: i32) -> (i32, i32, i32) {
    %c0_i32 = arith.constant 0 : i32
    %c0_i32_0 = arith.constant 0 : i32
    %c0_i32_1 = arith.constant 0 : i32
    return %arg0, %c0_i32, %c0_i32_0 : i32, i32, i32
  }
  func.func @transform_1(%arg0: i32) -> (i32, i32) {
    %c0_i32 = arith.constant 0 : i32
    %c0_i32_0 = arith.constant 0 : i32
    %c0_i32_1 = arith.constant 0 : i32
    return %c0_i32, %c0_i32_0 : i32, i32
  }
  func.func @transform_2(%arg0: i32) -> (i32, i32) {
    %c0_i32 = arith.constant 0 : i32
    %c0_i32_0 = arith.constant 0 : i32
    %c0_i32_1 = arith.constant 0 : i32
    return %c0_i32, %c0_i32_0 : i32, i32
  }
  func.func @transform_3(%arg0: i32) -> (i32, i32) {
    %c0_i32 = arith.constant 0 : i32
    %c0_i32_0 = arith.constant 0 : i32
    %c0_i32_1 = arith.constant 0 : i32
    return %c0_i32, %c0_i32_0 : i32, i32
  }
  func.func @transform_4(%arg0: i32) -> (i32, i32) {
    %c0_i32 = arith.constant 0 : i32
    %c0_i32_0 = arith.constant 0 : i32
    %c0_i32_1 = arith.constant 0 : i32
    return %c0_i32, %c0_i32_0 : i32, i32
  }
  func.func @transform_5(%arg0: i32) -> (i32, i32) {
    %c0_i32 = arith.constant 0 : i32
    %c0_i32_0 = arith.constant 0 : i32
    %c0_i32_1 = arith.constant 0 : i32
    return %c0_i32, %c0_i32_0 : i32, i32
  }
  func.func @transform_6(%arg0: i32) -> (i32, i32) {
    %c0_i32 = arith.constant 0 : i32
    %c0_i32_0 = arith.constant 0 : i32
    %c0_i32_1 = arith.constant 0 : i32
    return %c0_i32, %c0_i32_0 : i32, i32
  }
  func.func @transform_7(%arg0: i32) -> (i32, i32, i32) {
    %c0_i32 = arith.constant 0 : i32
    %c0_i32_0 = arith.constant 0 : i32
    %c0_i32_1 = arith.constant 0 : i32
    return %arg0, %c0_i32, %c0_i32_0 : i32, i32, i32
  }
}

</mosaic_0001>

<bundles_post_ra>
// kernel: tpu_custom_call.1
= control target key start
LH: loop header
LB: loop body
LE: loop exit
PB: predicated region body
PF: predicated region fallthrough
CT: control target
= control target key end

     0   :  { %s2015_s24 = smov 0   ;;  %s2728_s0 = inlined_call_operand.vmem [shape: f32[2,64,32], index: 0, kind: input, shape index: {}]   ;;  %s2729_s1 = inlined_call_operand.vmem [shape: f32[32,96], index: 1, kind: input, shape index: {}]   ;;  %s2730_s2 = inlined_call_operand.vmem [shape: f32[1,96], index: 2, kind: input, shape index: {}]   ;;  %s2731_s3 = inlined_call_operand.vmem [shape: f32[32,32], index: 3, kind: input, shape index: {}]   ;;  %s2732_s4 = inlined_call_operand.vmem [shape: f32[1,32], index: 4, kind: input, shape index: {}]   ;;  %s2733_s5 = inlined_call_operand.vmem [shape: f32[1,32], index: 5, kind: input, shape index: {}]   ;;  %s2734_s6 = inlined_call_operand.vmem [shape: f32[32,32], index: 6, kind: input, shape index: {}]   ;;  %s2735_s7 = inlined_call_operand.vmem [shape: f32[2,64,32], index: 7, kind: output, shape index: {}]  }
   0x1 LB: > { %s1846_s25 = sadd.s32 4294967295, %s1963_s24   ;;  %p1850_p0 = scmp.ge.s32.totalorder %s1963_s24, 1  ;;  %s1963_s24 = sphi %s2015_s24, %s17_s24  }
   0x2   : > { %p237_p1 = scmp.lt.s32.totalorder %s1963_s24, 3 }
   0x4   : > { %p238_p2 = pnand %p1850_p0, %p237_p1 }
   0x5   : > { %p269_p3 = scmp.lt.s32.totalorder (!%p238_p2), %s1846_s25, 1  ;;  %s1965_s17 = smov (!%p238_p2), 96  }
   0x6   : > { %241 = sbr.rel (%p238_p2) target bundleno = 1542 (0x606), region = 48  ;;  %s1966_s30 = smov (!%p238_p2), 64  }
   0x7   : > { %s1968_s8 = smov (!%p238_p2), 120   ;;  %s1969_s9 = smov (!%p238_p2), 112  }
   0x8   : > { %s1971_s10 = smov (!%p238_p2), 104   ;;  %s1972_s12 = smov (!%p238_p2), 8  }
   0x9   : > { %s1973_s13 = smov (!%p238_p2), 16  }
   0xb   : > { %v290_v0 = vld [vmem:[%s2729_s1 + $0x18] sm:$0xff]  ;;  %v289_v1 = vld [vmem:[%s2729_s1 + $0x10] sm:$0xff]  ;;  %v288_v2 = vld [vmem:[%s2729_s1 + $0x8] sm:$0xff]  ;;  %s2739_s25 = smov (!%p269_p3, %s1846_s25), 1  ;;  %vm295_vm0 = vcmask 261120   ;;  %vm361_vm1 = vcmask 785408  }
   0xc   : > { %332 = vmatpush.msra.mxu0 %v290_v0  ;;  %v287_v3 = vld [vmem:[%s2729_s1] sm:$0xff]  ;;  %s1889_s11 = sshll.u32 %s2739_s25, 6  ;;  %vm426_vm2 = vcmask 523520   ;;  %vm531_vm9 = vcmask 523264  }
   0xd   : > { %s273_s14 = scalar_lea.vmem %s2728_s0, %s1889_s11  ;;  %v1934_v12 = vld [vmem:[%s2730_s2] ss:$0 sm:$0xff]  ;;  %s2702_s29 = scalar_lea.vmem %s2735_s7, %s1889_s11 }
   0xe   : > { %333 = vmatpush.msra.mxu0 %v289_v1  ;;  %v279_v4 = vld [vmem:[%s273_s14] sm:$0xff]  ;;  %v280_v5 = vld [vmem:[%s273_s14 + $0x8] sm:$0xff]  ;;  %v281_v6 = vld [vmem:[%s273_s14 + $0x10] sm:$0xff] }
   0xf   : > { %v282_v7 = vld [vmem:[%s273_s14 + $0x18] sm:$0xff]  ;;  %v283_v8 = vld [vmem:[%s273_s14 + $0x20] sm:$0xff]  ;;  %v284_v9 = vld [vmem:[%s273_s14 + $0x28] sm:$0xff] }
  0x10   : > { %334 = vmatpush.msra.mxu0 %v288_v2  ;;  %v285_v10 = vld [vmem:[%s273_s14 + $0x30] sm:$0xff]  ;;  %v286_v11 = vld [vmem:[%s273_s14 + $0x38] sm:$0xff]  ;;  %s1974_s14 = smov 24  }
  0x12   : > { %335 = vmatpush.msra.mxu0 %v287_v3 }
  0x13   : > { %1855 = vmatmul.msk.f32.vlgmr.msra.gmra.mxu0 %vm295_vm0, %v279_v4 }
  0x1b   : > { %1856 = vmatmul.msk.f32.gmra.mxu0 %vm295_vm0, %v280_v5 }
  0x23   : > { %1857 = vmatmul.msk.f32.gmra.mxu0 %vm295_vm0, %v281_v6 }
  0x2b   : > { %1858 = vmatmul.msk.f32.gmra.mxu0 %vm295_vm0, %v282_v7 }
  0x33   : > { %1859 = vmatmul.msk.f32.gmra.mxu0 %vm295_vm0, %v283_v8 }
  0x3b   : > { %1860 = vmatmul.msk.f32.gmra.mxu0 %vm295_vm0, %v284_v9 }
  0x43   : > { %1861 = vmatmul.msk.f32.gmra.mxu0 %vm295_vm0, %v285_v10 }
  0x4b   : > { %1862 = vmatmul.msk.f32.gmra.mxu0 %vm295_vm0, %v286_v11 }
  0x90   : > { %v337_v13 = vpop.f32.mrf.mxu0 }
  0x91   : > { %v338_v14 = vadd.f32 %v1934_v12, %v337_v13 }
  0x93   : > { %362 = vst.msk [vmem:[#allocation2] sm:$0xff] %vm361_vm1, %v338_v14 }
  0x98   : > { %v340_v15 = vpop.f32.mrf.mxu0 }
  0x99   : > { %v341_v16 = vadd.f32 %v1934_v12, %v340_v15 }
  0x9a   : > { %v2062_v28 = vld [vmem:[#allocation2] sm:$0xff] }
  0x9b   : > { %363 = vst.msk [vmem:[#allocation2 + $0x8] sm:$0xff] %vm361_vm1, %v341_v16  ;;  %v378_v32 = vmul.f32 %v2062_v28, %v2062_v28 }
  0x9d   : > { %v386_v40 = vsel %vm295_vm0, %v378_v32, 0.0  ;;  %v427_v41 = vsel %vm426_vm2, %v378_v32, 0.0 }
  0xa0   : > { %v343_v17 = vpop.f32.mrf.mxu0 }
  0xa1   : > { %v344_v18 = vadd.f32 %v1934_v12, %v343_v17 }
  0xa2   : > { %v2060_v26 = vld [vmem:[#allocation2 + $0x8] sm:$0xff] }
  0xa3   : > { %364 = vst.msk [vmem:[#allocation2 + $0x10] sm:$0xff] %vm361_vm1, %v344_v18  ;;  %v379_v30 = vmul.f32 %v2060_v26, %v2060_v26 }
  0xa5   : > { %v387_v36 = vsel %vm295_vm0, %v379_v30, 0.0  ;;  %v428_v37 = vsel %vm426_vm2, %v379_v30, 0.0 }
  0xa6   : > { %v388_v47 = vadd.f32 %v387_v36, %v386_v40  ;;  %v429_v48 = vadd.f32 %v428_v37, %v427_v41 }
  0xa8   : > { %v346_v19 = vpop.f32.mrf.mxu0 }
  0xa9   : > { %v347_v20 = vadd.f32 %v1934_v12, %v346_v19 }
  0xaa   : > { %v2064_v29 = vld [vmem:[#allocation2 + $0x10] sm:$0xff] }
  0xab   : > { %365 = vst.msk [vmem:[#allocation2 + $0x18] sm:$0xff] %vm361_vm1, %v347_v20  ;;  %v380_v33 = vmul.f32 %v2064_v29, %v2064_v29 }
  0xad   : > { %v389_v44 = vsel %vm295_vm0, %v380_v33, 0.0  ;;  %v430_v45 = vsel %vm426_vm2, %v380_v33, 0.0 }
  0xae   : > { %v390_v52 = vadd.f32 %v389_v44, %v388_v47  ;;  %v431_v53 = vadd.f32 %v430_v45, %v429_v48 }
  0xb0   : > { %v349_v21 = vpop.f32.mrf.mxu0 }
  0xb1   : > { %v350_v22 = vadd.f32 %v1934_v12, %v349_v21 }
  0xb2   : > { %v2069_v31 = vld [vmem:[#allocation2 + $0x18] sm:$0xff] }
  0xb3   : > { %366 = vst.msk [vmem:[#allocation2 + $0x20] sm:$0xff] %vm361_vm1, %v350_v22  ;;  %v381_v35 = vmul.f32 %v2069_v31, %v2069_v31 }
  0xb5   : > { %v391_v50 = vsel %vm295_vm0, %v381_v35, 0.0  ;;  %v432_v51 = vsel %vm426_vm2, %v381_v35, 0.0 }
  0xb6   : > { %v392_v57 = vadd.f32 %v391_v50, %v390_v52  ;;  %v433_v58 = vadd.f32 %v432_v51, %v431_v53 }
  0xb8   : > { %v352_v23 = vpop.f32.mrf.mxu0 }
  0xb9   : > { %v353_v24 = vadd.f32 %v1934_v12, %v352_v23 }
  0xba   : > { %v2075_v34 = vld [vmem:[#allocation2 + $0x20] sm:$0xff] }
  0xbb   : > { %367 = vst.msk [vmem:[#allocation2 + $0x28] sm:$0xff] %vm361_vm1, %v353_v24  ;;  %v382_v43 = vmul.f32 %v2075_v34, %v2075_v34 }
  0xbd   : > { %v393_v55 = vsel %vm295_vm0, %v382_v43, 0.0  ;;  %v434_v56 = vsel %vm426_vm2, %v382_v43, 0.0 }
  0xbe   : > { %v394_v61 = vadd.f32 %v393_v55, %v392_v57  ;;  %v435_v62 = vadd.f32 %v434_v56, %v433_v58 }
  0xc0   : > { %v355_v25 = vpop.f32.mrf.mxu0 }
  0xc1   : > { %v356_v27 = vadd.f32 %v1934_v12, %v355_v25 }
  0xc2   : > { %v2081_v39 = vld [vmem:[#allocation2 + $0x28] sm:$0xff] }
  0xc3   : > { %368 = vst.msk [vmem:[#allocation2 + $0x30] sm:$0xff] %vm361_vm1, %v356_v27  ;;  %v383_v49 = vmul.f32 %v2081_v39, %v2081_v39 }
  0xc5   : > { %v395_v59 = vsel %vm295_vm0, %v383_v49, 0.0  ;;  %v436_v60 = vsel %vm426_vm2, %v383_v49, 0.0 }
  0xc6   : > { %v396_v2 = vadd.f32 %v395_v59, %v394_v61  ;;  %v437_v3 = vadd.f32 %v436_v60, %v435_v62 }
  0xc8   : > { %v358_v38 = vpop.f32.mrf.mxu0 }
  0xc9   : > { %v359_v42 = vadd.f32 %v1934_v12, %v358_v38 }
  0xca   : > { %v2089_v46 = vld [vmem:[#allocation2 + $0x30] sm:$0xff] }
  0xcb   : > { %369 = vst.msk [vmem:[#allocation2 + $0x38] sm:$0xff] %vm361_vm1, %v359_v42  ;;  %v384_v54 = vmul.f32 %v2089_v46, %v2089_v46 }
  0xcd   : > { %v397_v63 = vsel %vm295_vm0, %v384_v54, 0.0  ;;  %v438_v0 = vsel %vm426_vm2, %v384_v54, 0.0 }
  0xce   : > { %v398_v5 = vadd.f32 %v397_v63, %v396_v2  ;;  %v439_v6 = vadd.f32 %v438_v0, %v437_v3 }
  0xd2   : > { %v2104_v1 = vld [vmem:[#allocation2 + $0x38] sm:$0xff] }
  0xd3   : > { %v385_v4 = vmul.f32 %v2104_v1, %v2104_v1 }
  0xd5   : > { %v399_v7 = vsel %vm295_vm0, %v385_v4, 0.0  ;;  %v440_v8 = vsel %vm426_vm2, %v385_v4, 0.0 }
  0xd6   : > { %v400_v9 = vadd.f32 %v399_v7, %v398_v5  ;;  %v441_v10 = vadd.f32 %v440_v8, %v439_v6 }
  0xd8   : > { %v401_v11 = vrot.slane %v400_v9, 4  ;;  %v442_v12 = vrot.slane %v441_v10, 4 }
  0xda   : > { %v402_v13 = vadd.f32 %v401_v11, %v400_v9  ;;  %v443_v14 = vadd.f32 %v442_v12, %v441_v10 }
  0xdc   : > { %v403_v15 = vrot.slane %v402_v13, 2  ;;  %v444_v16 = vrot.slane %v443_v14, 2 }
  0xde   : > { %v404_v17 = vadd.f32 %v403_v15, %v402_v13  ;;  %v445_v18 = vadd.f32 %v444_v16, %v443_v14 }
  0xe0   : > { %v405_v19 = vrot.slane %v404_v17, 1  ;;  %v446_v20 = vrot.slane %v445_v18, 1 }
  0xe2   : > { %v406_v21 = vadd.f32 %v405_v19, %v404_v17  ;;  %v447_v22 = vadd.f32 %v446_v20, %v445_v18 }
  0xe4   : > { %v407_v23 = vmax.f32 %v406_v21, 1e-24  ;;  %v448_v24 = vmax.f32 %v447_v22, 1e-24  ;;  %v1935_v21 = vld [vmem:[%s2733_s5] ss:$0 sm:$0xff] }
  0xe6   : > { %1937 = vrsqrt.f32 %v407_v23  ;;  %vm414_vm5 = vweird.f32 %v407_v23  ;;  %vm455_vm7 = vweird.f32 %v448_v24 }
  0xe7   : > { %1939 = vrsqrt.f32 %v448_v24 }
  0xec   : > { %v1938_v25 = vpop.eup %1937 }
  0xed   : > { %v1940_v27 = vpop.eup %1939  ;;  %v409_v30 = vmul.f32 %v1938_v25, %v407_v23  ;;  %vm415_vm3 = vweird.f32 %v1938_v25  ;;  %v583_v23 = vld [vmem:[%s2734_s6 + $0x10] sm:$0xff] }
  0xee   : > { %v450_v32 = vmul.f32 %v1940_v27, %v448_v24  ;;  %vm456_vm4 = vweird.f32 %v1940_v27  ;;  %vm416_vm6 = vmor %vm414_vm5, %vm415_vm3 }
  0xef   : > { %v410_v33 = vmul.f32 %v1938_v25, %v409_v30  ;;  %vm457_vm8 = vmor %vm455_vm7, %vm456_vm4 }
  0xf0   : > { %v451_v35 = vmul.f32 %v1940_v27, %v450_v32  ;;  %v581_v32 = vld [vmem:[%s2734_s6] sm:$0xff] }
  0xf1   : > { %v411_v36 = vmul.f32 0.5, %v410_v33 }
  0xf2   : > { %v452_v37 = vmul.f32 0.5, %v451_v35  ;;  %v584_v35 = vld [vmem:[%s2734_s6 + $0x18] sm:$0xff] }
  0xf3   : > { %v412_v38 = vsub.f32 1.5, %v411_v36 }
  0xf4   : > { %v453_v40 = vsub.f32 1.5, %v452_v37 }
  0xf5   : > { %v413_v41 = vmul.f32 %v1938_v25, %v412_v38 }
  0xf6   : > { %v454_v42 = vmul.f32 %v1940_v27, %v453_v40 }
  0xf7   : > { %v417_v43 = vsel %vm416_vm6, %v1938_v25, %v413_v41 }
  0xf8   : > { %v418_v44 = vmul.f32 %v417_v43, %v2062_v28  ;;  %v458_v45 = vsel %vm457_vm8, %v1940_v27, %v454_v42  ;;  %v419_v57 = vmul.f32 %v417_v43, %v2060_v26  ;;  %v420_v60 = vmul.f32 %v417_v43, %v2064_v29 }
  0xf9   : > { %v465_v47 = vmul.f32 %v458_v45, %v2089_v46  ;;  %v466_v48 = vmul.f32 %v458_v45, %v2104_v1  ;;  %v461_v49 = vmul.f32 %v458_v45, %v2064_v29  ;;  %v462_v50 = vmul.f32 %v458_v45, %v2069_v31 }
  0xfa   : > { %467 = vxpose.xlu2.b32.start [1/8] (short) (narrow) %v418_v44, 32  ;;  %v463_v53 = vmul.f32 %v458_v45, %v2075_v34  ;;  %v464_v54 = vmul.f32 %v458_v45, %v2081_v39  ;;  %v459_v55 = vmul.f32 %v458_v45, %v2062_v28  ;;  %v460_v56 = vmul.f32 %v458_v45, %v2060_v26 }
  0xfb   : > { %v1914_v51 = vpack.i.bf16 %v465_v47, %v466_v48  ;;  %v1924_v52 = vpack.i.bf16 %v461_v49, %v462_v50  ;;  %v421_v61 = vmul.f32 %v417_v43, %v2069_v31  ;;  %v422_v62 = vmul.f32 %v417_v43, %v2075_v34 }
  0xfc   : > { %v1919_v58 = vpack.i.bf16 %v463_v53, %v464_v54  ;;  %v1929_v59 = vpack.i.bf16 %v459_v55, %v460_v56  ;;  %v423_v63 = vmul.f32 %v417_v43, %v2081_v39  ;;  %v424_v0 = vmul.f32 %v417_v43, %v2089_v46 }
  0xfd   : > { %1915 = vrot.lane.b32.xlu0 %v1914_v51, %s1965_s17  ;;  %1925 = vrot.lane.b32.xlu1 %v1924_v52, %s1965_s17  ;;  %v425_v2 = vmul.f32 %v417_v43, %v2104_v1  ;;  %v582_v43 = vld [vmem:[%s2734_s6 + $0x8] sm:$0xff] }
 0x102   : > { %468 = vxpose.xlu2.b32.cont [2/8] (short) (narrow) %v419_v57, 32 }
 0x105   : > { %1920 = vrot.lane.b32.xlu0 %v1919_v58, %s1965_s17  ;;  %1930 = vrot.lane.b32.xlu1 %v1929_v59, %s1965_s17 }
 0x10a   : > { %469 = vxpose.xlu2.b32.cont [3/8] (short) (narrow) %v420_v60, 32 }
 0x112   : > { %470 = vxpose.xlu2.b32.cont [4/8] (short) (narrow) %v421_v61, 32 }
 0x11a   : > { %471 = vxpose.xlu2.b32.cont [5/8] (short) (narrow) %v422_v62, 32 }
 0x122   : > { %472 = vxpose.xlu2.b32.cont [6/8] (short) (narrow) %v423_v63, 32 }
 0x12a   : > { %473 = vxpose.xlu2.b32.cont [7/8] (short) (narrow) %v424_v0, 32 }
 0x132   : > { %474 = vxpose.xlu2.b32.end [8/8] (short) (narrow) %v425_v2, 32 }
 0x16f   : > { %v1916_v3 = vpop.permute.xlu0 %1915  ;;  %v1926_v6 = vpop.permute.xlu1 %1925 }
 0x170   : > { %v1917_v4 = vunpack.i.l.bf16 %v1916_v3  ;;  %v1918_v5 = vunpack.i.h.bf16 %v1916_v3  ;;  %v1927_v10 = vunpack.i.l.bf16 %v1926_v6  ;;  %v1928_v12 = vunpack.i.h.bf16 %v1926_v6 }
 0x172   : > { %552 = vmatpush.msra.mxu1 %v1917_v4 }
 0x174   : > { %553 = vmatpush.msra.mxu1 %v1918_v5 }
 0x177   : > { %v1921_v7 = vpop.permute.xlu0 %1920  ;;  %v1931_v11 = vpop.permute.xlu1 %1930 }
 0x178   : > { %v1922_v8 = vunpack.i.l.bf16 %v1921_v7  ;;  %v1923_v9 = vunpack.i.h.bf16 %v1921_v7  ;;  %v1932_v13 = vunpack.i.l.bf16 %v1931_v11  ;;  %v1933_v14 = vunpack.i.h.bf16 %v1931_v11 }
 0x17a   : > { %554 = vmatpush.msra.mxu1 %v1922_v8 }
 0x17c   : > { %555 = vmatpush.msra.mxu1 %v1923_v9 }
 0x17e   : > { %556 = vmatpush.msra.mxu1 %v1927_v10 }
 0x180   : > { %557 = vmatpush.msra.mxu1 %v1928_v12 }
 0x182   : > { %558 = vmatpush.msra.mxu1 %v1932_v13 }
 0x184   : > { %559 = vmatpush.msra.mxu1 %v1933_v14 }
 0x193   : > { %v483_v15 = vpop.trf.xlu2 }
 0x194   : > { %1863 = vmatmul.msk.f32.vlgmr.msra.gmra.mxu1 %vm531_vm9, %v483_v15 }
 0x19b   : > { %v484_v16 = vpop.trf.xlu2 }
 0x19c   : > { %1864 = vmatmul.msk.f32.gmra.mxu1 %vm531_vm9, %v484_v16 }
 0x1a3   : > { %v485_v17 = vpop.trf.xlu2 }
 0x1a4   : > { %1865 = vmatmul.msk.f32.gmra.mxu1 %vm531_vm9, %v485_v17 }
 0x1ab   : > { %v486_v18 = vpop.trf.xlu2 }
 0x1ac   : > { %1866 = vmatmul.msk.f32.gmra.mxu1 %vm531_vm9, %v486_v18 }
 0x211   : > { %v561_v19 = vpop.f32.mrf.mxu1 }
 0x212   : > { %v577_v27 = vmul.f32 %v1935_v21, %v561_v19 }
 0x214   : > { %v585_v37 = vadd.f32 %v581_v32, %v577_v27 }
 0x216   : > { %v589_v41 = vsel %vm295_vm0, %v585_v37, -inf }
 0x219   : > { %v564_v20 = vpop.f32.mrf.mxu1 }
 0x21a   : > { %v578_v40 = vmul.f32 %v1935_v21, %v564_v20 }
 0x21c   : > { %v586_v44 = vadd.f32 %v582_v43, %v578_v40 }
 0x21e   : > { %v592_v45 = vsel %vm295_vm0, %v586_v44, -inf }
 0x221   : > { %v567_v22 = vpop.f32.mrf.mxu1 }
 0x222   : > { %v579_v24 = vmul.f32 %v1935_v21, %v567_v22 }
 0x224   : > { %v587_v25 = vadd.f32 %v583_v23, %v579_v24 }
 0x226   : > { %v595_v30 = vsel %vm295_vm0, %v587_v25, -inf }
 0x227   : > { %596 = vmax.xlane.f32.xlu1 %v595_v30 }
 0x229   : > { %v570_v33 = vpop.f32.mrf.mxu1 }
 0x22a   : > { %v580_v36 = vmul.f32 %v1935_v21, %v570_v33 }
 0x22c   : > { %v588_v38 = vadd.f32 %v584_v35, %v580_v36 }
 0x22e   : > { %v598_v42 = vsel %vm295_vm0, %v588_v38, -inf }
 0x22f   : > { %590 = vmax.xlane.f32.xlu1 %v589_v41  ;;  %599 = vmax.xlane.f32.xlu0 %v598_v42 }
 0x237   : > { %593 = vmax.xlane.f32.xlu0 %v592_v45 }
 0x29a   : > { %v597_v47 = vpop.xlane.xlu1 %596 }
 0x29b   : > { %v603_v48 = vsub.f32 %v587_v25, %v597_v47 }
 0x29d   : > { %v609_v49 = vmul.f32 1.442695, %v603_v48 }
 0x29f   : > { %1941 = vpow2.f32 %v609_v49 }
 0x2a2   : > { %v591_v50 = vpop.xlane.xlu1 %590  ;;  %v600_v51 = vpop.xlane.xlu0 %599 }
 0x2a3   : > { %v601_v52 = vsub.f32 %v585_v37, %v591_v50  ;;  %v604_v53 = vsub.f32 %v588_v38, %v600_v51 }
 0x2a5   : > { %v2145_v54 = vpop.eup %1941  ;;  %v605_v55 = vmul.f32 1.442695, %v601_v52  ;;  %v611_v56 = vmul.f32 1.442695, %v604_v53 }
 0x2a6   : > { %v619_v57 = vsel %vm295_vm0, %v2145_v54, 0.0 }
 0x2a7   : > { %1943 = vpow2.f32 %v605_v55  ;;  %620 = vadd.xlane.f32.xlu0 %v619_v57 }
 0x2a8   : > { %1945 = vpow2.f32 %v611_v56 }
 0x2aa   : > { %v594_v58 = vpop.xlane.xlu0 %593 }
 0x2ab   : > { %v602_v59 = vsub.f32 %v586_v44, %v594_v58 }
 0x2ad   : > { %v2149_v60 = vpop.eup %1943  ;;  %v607_v61 = vmul.f32 1.442695, %v602_v59 }
 0x2ae   : > { %v1946_v62 = vpop.eup %1945  ;;  %v613_v63 = vsel %vm295_vm0, %v2149_v60, 0.0 }
 0x2af   : > { %1947 = vpow2.f32 %v607_v61  ;;  %614 = vadd.xlane.f32.xlu0 %v613_v63  ;;  %v622_v0 = vsel %vm295_vm0, %v1946_v62, 0.0  ;;  %v1967_v63 = vmov 1983009808  }
 0x2b0   : > { %623 = vadd.xlane.f32.xlu2 %v622_v0  ;;  %v806_v0 = vunpack.c.l.s4 %v1967_v63 }
 0x2b5   : > { %v2154_v2 = vpop.eup %1947 }
 0x2b6   : > { %v616_v3 = vsel %vm295_vm0, %v2154_v2, 0.0 }
 0x2b7   : > { %617 = vadd.xlane.f32.xlu1 %v616_v3 }
 0x2c3   : > { %697 = vrot.lane.b32.xlu0 %v2064_v29, %s1966_s30 }
 0x2cb   : > { %701 = vrot.lane.b32.xlu0 %v2075_v34, %s1966_s30 }
 0x2d0   : > { %695 = vrot.lane.b32.xlu1 %v2060_v26, %s1966_s30 }
 0x2d3   : > { %705 = vrot.lane.b32.xlu0 %v2089_v46, %s1966_s30 }
 0x2d8   : > { %699 = vrot.lane.b32.xlu1 %v2069_v31, %s1966_s30 }
 0x2db   : > { %707 = vrot.lane.b32.xlu0 %v2104_v1, %s1966_s30 }
 0x2e0   : > { %703 = vrot.lane.b32.xlu1 %v2081_v39, %s1966_s30 }
 0x2e8   : > { %693 = vrot.lane.b32.xlu1 %v2062_v28, %s1966_s30 }
 0x31a   : > { %v621_v4 = vpop.xlane.xlu0 %620 }
 0x31b   : > { %1949 = vrcp.f32 %v621_v4  ;;  %vm658_vm12 = vweird.f32 %v621_v4  ;;  %v664_v14 = vand.u32 2147483648, %v621_v4  ;;  %v662_v18 = vand.u32 2147483647, %v621_v4 }
 0x31d   : > { %v665_v24 = vor.u32 1.1754944e-38, %v664_v14  ;;  %vm663_vm2 = vcmp.eq.f32.partialorder %v662_v18, 8.507059e+37 }
 0x321   : > { %v1950_v5 = vpop.eup %1949 }
 0x322   : > { %v2166_v6 = vpop.xlane.xlu0 %614  ;;  %v654_v29 = vmul.f32 %v1950_v5, %v621_v4  ;;  %vm659_vm10 = vweird.f32 %v1950_v5 }
 0x323   : > { %v624_v7 = vpop.xlane.xlu2 %623  ;;  %1951 = vrcp.f32 %v2166_v6  ;;  %vm2173_vm14 = vmor %vm658_vm12, %vm659_vm10  ;;  %v636_v38 = vand.u32 2147483648, %v2166_v6  ;;  %vm630_vm6 = vweird.f32 %v2166_v6  ;;  %v634_v43 = vand.u32 2147483647, %v2166_v6 }
 0x324   : > { %1953 = vrcp.f32 %v624_v7  ;;  %v655_v26 = vsub.f32 1.0, %v654_v29  ;;  %v678_v9 = vand.u32 2147483648, %v624_v7  ;;  %v676_v10 = vand.u32 2147483647, %v624_v7 }
 0x325   : > { %vm672_vm13 = vweird.f32 %v624_v7  ;;  %v637_v48 = vor.u32 1.1754944e-38, %v636_v38  ;;  %vm635_vm10 = vcmp.eq.f32.partialorder %v634_v43, 8.507059e+37  ;;  %vm987_vm12 = vcmask 64512  }
 0x326   : > { %v656_v1 = vmul.f32 %v1950_v5, %v655_v26  ;;  %v679_v19 = vor.u32 1.1754944e-38, %v678_v9  ;;  %vm677_vm1 = vcmp.eq.f32.partialorder %v676_v10, 8.507059e+37 }
 0x328   : > { %v657_v13 = vadd.f32 %v1950_v5, %v656_v1 }
 0x329   : > { %v2169_v34 = vpop.eup %1951 }
 0x32a   : > { %v1954_v31 = vpop.eup %1953  ;;  %v618_v46 = vpop.xlane.xlu1 %617  ;;  %v626_v28 = vmul.f32 %v2169_v34, %v2166_v6  ;;  %v661_v23 = vsel %vm2173_vm14, %v1950_v5, %v657_v13  ;;  %vm631_vm4 = vweird.f32 %v2169_v34  ;;  %v2222_v6 = vunpack.c.0.s8 %v806_v0 }
 0x32b   : > { %v668_v8 = vmul.f32 %v1954_v31, %v624_v7  ;;  %1955 = vrcp.f32 %v618_v46  ;;  %vm673_vm11 = vweird.f32 %v1954_v31  ;;  %v650_v30 = vand.u32 2147483648, %v618_v46  ;;  %vm632_vm9 = vmor %vm630_vm6, %vm631_vm4 }
 0x32c   : > { %v627_v12 = vsub.f32 1.0, %v626_v28  ;;  %vm674_vm15 = vmor %vm672_vm13, %vm673_vm11  ;;  %v666_v35 = vsel %vm663_vm2, %v665_v24, %v661_v23  ;;  %v648_v36 = vand.u32 2147483647, %v618_v46  ;;  %vm644_vm5 = vweird.f32 %v618_v46 }
 0x32d   : > { %v669_v39 = vsub.f32 1.0, %v668_v8  ;;  %v651_v41 = vor.u32 1.1754944e-38, %v650_v30  ;;  %v683_v42 = vmul.f32 %v2145_v54, %v666_v35  ;;  %vm803_vm11 = vcmask 1047556  }
 0x32e   : > { %v628_v21 = vmul.f32 %v2169_v34, %v627_v12  ;;  %vm649_vm8 = vcmp.eq.f32.partialorder %v648_v36, 8.507059e+37  ;;  %vm990_vm13 = vcmask 130048   ;;  %vm993_vm14 = vcmask 195584  }
 0x32f   : > { %v670_v11 = vmul.f32 %v1954_v31, %v669_v39 }
 0x330   : > { %v629_v37 = vadd.f32 %v2169_v34, %v628_v21 }
 0x331   : > { %v1956_v15 = vpop.eup %1955  ;;  %v671_v16 = vadd.f32 %v1954_v31, %v670_v11 }
 0x332   : > { %v640_v20 = vmul.f32 %v1956_v15, %v618_v46  ;;  %vm645_vm3 = vweird.f32 %v1956_v15  ;;  %v633_v47 = vsel %vm632_vm9, %v2169_v34, %v629_v37  ;;  %v1970_v34 = vmov 1934713408  }
 0x333   : > { %v675_v22 = vsel %vm674_vm15, %v1954_v31, %v671_v16  ;;  %vm646_vm7 = vmor %vm644_vm5, %vm645_vm3  ;;  %v638_v50 = vsel %vm635_vm10, %v637_v48, %v633_v47  ;;  %v820_v31 = vunpack.c.l.s4 %v1970_v34 }
 0x334   : > { %v641_v25 = vsub.f32 1.0, %v640_v20  ;;  %v680_v27 = vsel %vm677_vm1, %v679_v19, %v675_v22  ;;  %v681_v51 = vmul.f32 %v2149_v60, %v638_v50 }
 0x335   : > { %v684_v32 = vmul.f32 %v1946_v62, %v680_v27  ;;  %v698_v54 = vpop.permute.xlu0 %697  ;;  %v2247_v11 = vunpack.c.0.s8 %v820_v31 }
 0x336   : > { %v642_v33 = vmul.f32 %v1956_v15, %v641_v25 }
 0x337   : > { %1867 = vmatpush.xpose.msk.msrb.mxu1 %vm295_vm0, %v684_v32  ;;  %1891 = vmatpush.xpose.msk.msra.mxu2 %vm295_vm0, %v684_v32 }
 0x338   : > { %v643_v40 = vadd.f32 %v1956_v15, %v642_v33 }
 0x33a   : > { %v647_v44 = vsel %vm646_vm7, %v1956_v15, %v643_v40 }
 0x33b   : > { %1868 = vmatpush.xpose.msk.msrb.mxu1 %vm295_vm0, %v683_v42  ;;  %1892 = vmatpush.xpose.msk.msra.mxu2 %vm295_vm0, %v683_v42  ;;  %v652_v45 = vsel %vm649_vm8, %v651_v41, %v647_v44 }
 0x33c   : > { %v682_v49 = vmul.f32 %v2154_v2, %v652_v45 }
 0x33d   : > { %v702_v57 = vpop.permute.xlu0 %701 }
 0x33f   : > { %1869 = vmatpush.xpose.msk.msrb.mxu1 %vm295_vm0, %v682_v49  ;;  %1893 = vmatpush.xpose.msk.msra.mxu2 %vm295_vm0, %v682_v49 }
 0x342   : > { %v696_v52 = vpop.permute.xlu1 %695 }
 0x343   : > { %1870 = vmatpush.xpose.msk.msrb.mxu1 %vm295_vm0, %v681_v51  ;;  %1894 = vmatpush.xpose.msk.msra.mxu2 %vm295_vm0, %v681_v51 }
 0x345   : > { %v706_v58 = vpop.permute.xlu0 %705 }
 0x346   : > { %1872 = vmatmul.msk.f32.vlgmr.msra.gmra.mxu2 %vm295_vm0, %v696_v52 }
 0x34a   : > { %v700_v53 = vpop.permute.xlu1 %699 }
 0x34d   : > { %v708_v59 = vpop.permute.xlu0 %707 }
 0x34e   : > { %1873 = vmatmul.msk.f32.gmra.mxu2 %vm295_vm0, %v698_v54 }
 0x352   : > { %v704_v55 = vpop.permute.xlu1 %703 }
 0x356   : > { %1874 = vmatmul.msk.f32.gmra.mxu2 %vm295_vm0, %v700_v53 }
 0x35a   : > { %v694_v56 = vpop.permute.xlu1 %693 }
 0x35b   : > { %1871 = vmatmul.msk.f32.vlgmr.msrb.gmra.mxu1 %vm295_vm0, %v694_v56 }
 0x35e   : > { %1875 = vmatmul.msk.f32.gmra.mxu2 %vm295_vm0, %v702_v57 }
 0x366   : > { %1876 = vmatmul.msk.f32.gmra.mxu2 %vm295_vm0, %v704_v55 }
 0x36e   : > { %1877 = vmatmul.msk.f32.gmra.mxu2 %vm295_vm0, %v706_v58 }
 0x376   : > { %1878 = vmatmul.msk.f32.gmra.mxu2 %vm295_vm0, %v708_v59 }
 0x3c9   : > { %v2205_v60 = vpop.f32.mrf.mxu2 }
 0x3ca   : > { %v2210_v62 = vrot.slane %v2205_v60, 4 }
 0x3cc   : > { %v809_v4 = vrot.slane %v2210_v62, 4 }
 0x3d1   : > { %v2207_v61 = vpop.f32.mrf.mxu2 }
 0x3d2   : > { %v2239_v8 = vrot.slane %v2207_v61, 4 }
 0x3d8   : > { %v2212_v2 = vpop.f32.mrf.mxu1 }
 0x3d9   : > { %v2215_v3 = vrot.slane %v2212_v2, 4  ;;  %v2218_v5 = vpop.f32.mrf.mxu2  ;;  %996 = vrot.lane.b32.xlu1 %v2212_v2, %s1968_s8  ;;  %v804_v7 = vsel %vm803_vm11, %v2210_v62, %v2212_v2 }
 0x3da   : > { %v2225_v29 = vrot.slane %v2218_v5, 4  ;;  %1246 = vrot.lane.b32.xlu2 %v2218_v5, %s1969_s9  ;;  %v808_v28 = vperm.slane %v804_v7, %v2222_v6 }
 0x3db   : > { %v810_v26 = vsel %vm803_vm11, %v809_v4, %v2215_v3  ;;  %1236 = vrot.lane.b32.xlu0 %v2215_v3, %s1969_s9 }
 0x3dc   : > { %v814_v46 = vperm.slane %v810_v26, %v2222_v6  ;;  %v837_v1 = vrot.slane %v2225_v29, 4  ;;  %v832_v9 = vsel %vm803_vm11, %v2225_v29, %v2207_v61  ;;  %v817_v32 = vrot.slane %v808_v28, 4 }
 0x3dd   : > { %v836_v15 = vperm.slane %v832_v9, %v2222_v6 }
 0x3de   : > { %v815_v39 = vrot.slane %v814_v46, 4  ;;  %v838_v10 = vsel %vm803_vm11, %v837_v1, %v2239_v8  ;;  %v818_v43 = vsel %vm803_vm11, %v814_v46, %v817_v32 }
 0x3df   : > { %v842_v12 = vperm.slane %v838_v10, %v2222_v6  ;;  %v845_v37 = vrot.slane %v836_v15, 4  ;;  %v826_v47 = vperm.slane %v818_v43, %v2247_v11 }
 0x3e0   : > { %v816_v13 = vsel %vm803_vm11, %v815_v39, %v808_v28 }
 0x3e1   : > { %v822_v14 = vperm.slane %v816_v13, %v2247_v11  ;;  %v2253_v16 = vpop.f32.mrf.mxu2  ;;  %998 = vrot.lane.b32.xlu1 %v2215_v3, %s1968_s8  ;;  %v843_v17 = vrot.slane %v842_v12, 4  ;;  %v846_v44 = vsel %vm803_vm11, %v842_v12, %v845_v37  ;;  %v829_v54 = vrot.slane %v826_v47, 4 }
 0x3e2   : > { %1012 = vrot.lane.b32.xlu2 %v2253_v16, %s1968_s8  ;;  %v2276_v25 = vrot.slane %v2253_v16, 4  ;;  %v854_v49 = vperm.slane %v846_v44, %v2247_v11 }
 0x3e3   : > { %919 = vst [vmem:[#allocation1] ss:$2 sm:$0xff] %v822_v14  ;;  %1000 = vrot.lane.b32.xlu0 %v2205_v60, %s1968_s8  ;;  %v844_v18 = vsel %vm803_vm11, %v843_v17, %v836_v15  ;;  %v827_v20 = vrot.slane %v822_v14, 4  ;;  %v830_v4 = vsel %vm803_vm11, 0.0, %v829_v54 }
 0x3e4   : > { %v850_v19 = vperm.slane %v844_v18, %v2247_v11  ;;  %v857_v53 = vrot.slane %v854_v49, 4 }
 0x3e5   : > { %v828_v27 = vsel %vm803_vm11, 0.0, %v827_v20 }
 0x3e6   : > { %921 = vst [vmem:[#allocation1 + $0x1] ss:$2 sm:$0xff] %v850_v19  ;;  %v855_v23 = vrot.slane %v850_v19, 4  ;;  %v858_v59 = vsel %vm803_vm11, 0.0, %v857_v53 }
 0x3e8   : > { %v856_v35 = vsel %vm803_vm11, 0.0, %v855_v23 }
 0x3e9   : > { %v2263_v21 = vpop.f32.mrf.mxu2  ;;  %1238 = vrot.lane.b32.xlu1 %v2205_v60, %s1969_s9 }
 0x3ea   : > { %v2268_v22 = vrot.slane %v2263_v21, 4 }
 0x3eb   : > { %1240 = vrot.lane.b32.xlu0 %v2210_v62, %s1969_s9 }
 0x3ec   : > { %v865_v24 = vrot.slane %v2268_v22, 4  ;;  %1256 = vrot.lane.b32.xlu2 %v2268_v22, %s1969_s9  ;;  %v860_v33 = vsel %vm803_vm11, %v2268_v22, %v2253_v16 }
 0x3ed   : > { %v2279_v30 = vld.sshfl [vmem:[#allocation1] sm:$0xff pattern:$0x75316420]  ;;  %v864_v40 = vperm.slane %v860_v33, %v2222_v6 }
 0x3ee   : > { %934 = vst [vmem:[#allocation1] ss:$2 sm:$0xff] %v828_v27  ;;  %v866_v36 = vsel %vm803_vm11, %v865_v24, %v2276_v25 }
 0x3ef   : > { %936 = vst [vmem:[#allocation1 + $0x1] ss:$2 sm:$0xff] %v856_v35  ;;  %v870_v38 = vperm.slane %v866_v36, %v2222_v6  ;;  %v873_v9 = vrot.slane %v864_v40, 4 }
 0x3f1   : > { %v2289_v41 = vpop.f32.mrf.mxu2  ;;  %1002 = vrot.lane.b32.xlu1 %v2210_v62, %s1968_s8  ;;  %v871_v42 = vrot.slane %v870_v38, 4  ;;  %v874_v13 = vsel %vm803_vm11, %v870_v38, %v873_v9 }
 0x3f2   : > { %v2318_v56 = vrot.slane %v2289_v41, 4 }
 0x3f3   : > { %1004 = vrot.lane.b32.xlu0 %v2207_v61, %s1968_s8  ;;  %v872_v45 = vsel %vm803_vm11, %v871_v42, %v864_v40 }
 0x3f4   : > { %1254 = vrot.lane.b32.xlu2 %v2263_v21, %s1969_s9  ;;  %v878_v48 = vperm.slane %v872_v45, %v2247_v11 }
 0x3f6   : > { %v2303_v50 = vld.sshfl [vmem:[#allocation1] sm:$0xff pattern:$0x75316420]  ;;  %923 = vst [vmem:[#allocation1 + $0x10] ss:$2 sm:$0xff] %v878_v48  ;;  %v883_v46 = vrot.slane %v878_v48, 4 }
 0x3f7   : > { %953 = vst [vmem:[#allocation1] ss:$2 sm:$0xff] %v826_v47 }
 0x3f8   : > { %955 = vst [vmem:[#allocation1 + $0x1] ss:$2 sm:$0xff] %v854_v49  ;;  %v884_v28 = vsel %vm803_vm11, 0.0, %v883_v46 }
 0x3f9   : > { %v2305_v51 = vpop.f32.mrf.mxu2  ;;  %1006 = vrot.lane.b32.xlu1 %v2239_v8, %s1968_s8 }
 0x3fa   : > { %v2310_v52 = vrot.slane %v2305_v51, 4 }
 0x3fb   : > { %1244 = vrot.lane.b32.xlu0 %v2239_v8, %s1969_s9 }
 0x3fc   : > { %v893_v55 = vrot.slane %v2310_v52, 4  ;;  %1250 = vrot.lane.b32.xlu2 %v2253_v16, %s1969_s9  ;;  %v888_v57 = vsel %vm803_vm11, %v2310_v52, %v2289_v41 }
 0x3fd   : > { %v892_v7 = vperm.slane %v888_v57, %v2222_v6 }
 0x3fe   : > { %v894_v58 = vsel %vm803_vm11, %v893_v55, %v2318_v56 }
 0x3ff   : > { %v2326_v63 = vld.sshfl [vmem:[#allocation1] sm:$0xff pattern:$0x75316420]  ;;  %v898_v0 = vperm.slane %v894_v58, %v2222_v6  ;;  %v901_v12 = vrot.slane %v892_v7, 4 }
 0x400   : > { %974 = vst [vmem:[#allocation1 + $0x1] ss:$2 sm:$0xff] %v858_v59 }
 0x401   : > { %972 = vst [vmem:[#allocation1] ss:$2 sm:$0xff] %v830_v4  ;;  %1248 = vrot.lane.b32.xlu1 %v2225_v29, %s1969_s9  ;;  %v899_v26 = vrot.slane %v898_v0, 4 }
 0x403   : > { %1008 = vrot.lane.b32.xlu0 %v2218_v5, %s1968_s8  ;;  %v900_v34 = vsel %vm803_vm11, %v899_v26, %v892_v7 }
 0x404   : > { %1486 = vrot.lane.b32.xlu2 %v2225_v29, %s1971_s10  ;;  %v906_v31 = vperm.slane %v900_v34, %v2247_v11 }
 0x406   : > { %925 = vst [vmem:[#allocation1 + $0x11] ss:$2 sm:$0xff] %v906_v31  ;;  %v911_v1 = vrot.slane %v906_v31, 4 }
 0x408   : > { %v912_v10 = vsel %vm803_vm11, 0.0, %v911_v1  ;;  %v979_v44 = vld.sshfl [vmem:[#allocation1] sm:$0xff pattern:$0x75316420] }
 0x409   : > { %1014 = vrot.lane.b32.xlu1 %v2276_v25, %s1968_s8 }
 0x40b   : > { %1010 = vrot.lane.b32.xlu0 %v2225_v29, %s1968_s8  ;;  %v902_v29 = vsel %vm803_vm11, %v898_v0, %v901_v12 }
 0x40c   : > { %1482 = vrot.lane.b32.xlu2 %v2239_v8, %s1971_s10  ;;  %v882_v8 = vperm.slane %v874_v13, %v2247_v11  ;;  %v910_v14 = vperm.slane %v902_v29, %v2247_v11 }
 0x40d   : > { %v2346_v39 = vld.sshfl [vmem:[#allocation1 + $0x10] sm:$0xff pattern:$0x75316420] }
 0x40e   : > { %938 = vst [vmem:[#allocation1 + $0x10] ss:$2 sm:$0xff] %v884_v28  ;;  %v885_v17 = vrot.slane %v882_v8, 4  ;;  %v913_v18 = vrot.slane %v910_v14, 4 }
 0x40f   : > { %940 = vst [vmem:[#allocation1 + $0x11] ss:$2 sm:$0xff] %v912_v10 }
 0x410   : > { %v886_v19 = vsel %vm803_vm11, 0.0, %v885_v17  ;;  %v914_v23 = vsel %vm803_vm11, 0.0, %v913_v18 }
 0x411   : > { %1018 = vrot.lane.b32.xlu1 %v2268_v22, %s1968_s8 }
 0x413   : > { %1016 = vrot.lane.b32.xlu0 %v2263_v21, %s1968_s8 }
 0x414   : > { %1480 = vrot.lane.b32.xlu2 %v2207_v61, %s1971_s10 }
 0x416   : > { %v942_v15 = vld.sshfl [vmem:[#allocation1 + $0x10] sm:$0xff pattern:$0x75316420] }
 0x417   : > { %957 = vst [vmem:[#allocation1 + $0x10] ss:$2 sm:$0xff] %v882_v8 }
 0x418   : > { %959 = vst [vmem:[#allocation1 + $0x11] ss:$2 sm:$0xff] %v910_v14 }
 0x419   : > { %1020 = vrot.lane.b32.xlu1 %v2289_v41, %s1968_s8 }
 0x41b   : > { %1024 = vrot.lane.b32.xlu0 %v2305_v51, %s1968_s8 }
 0x41c   : > { %1490 = vrot.lane.b32.xlu2 %v2276_v25, %s1971_s10 }
 0x41f   : > { %v961_v20 = vld.sshfl [vmem:[#allocation1 + $0x10] sm:$0xff pattern:$0x75316420] }
 0x420   : > { %976 = vst [vmem:[#allocation1 + $0x10] ss:$2 sm:$0xff] %v886_v19 }
 0x421   : > { %1022 = vrot.lane.b32.xlu1 %v2318_v56, %s1968_s8  ;;  %978 = vst [vmem:[#allocation1 + $0x11] ss:$2 sm:$0xff] %v914_v23 }
 0x423   : > { %1026 = vrot.lane.b32.xlu0 %v2310_v52, %s1968_s8 }
 0x424   : > { %1500 = vrot.lane.b32.xlu2 %v2305_v51, %s1971_s10 }
 0x428   : > { %v980_v48 = vld.sshfl [vmem:[#allocation1 + $0x10] sm:$0xff pattern:$0x75316420] }
 0x429   : > { %1234 = vrot.lane.b32.xlu1 %v2212_v2, %s1969_s9 }
 0x42b   : > { %1242 = vrot.lane.b32.xlu0 %v2207_v61, %s1969_s9 }
 0x42c   : > { %943 = vrot.lane.b32.xlu2 %v2303_v50, %s1972_s12 }
 0x431   : > { %1260 = vrot.lane.b32.xlu1 %v2318_v56, %s1969_s9 }
 0x433   : > { %1252 = vrot.lane.b32.xlu0 %v2276_v25, %s1969_s9 }
 0x434   : > { %945 = vrot.lane.b32.xlu2 %v942_v15, %s1972_s12  ;;  %v2432_v49 = vpop.permute.xlu2 %1246 }
 0x439   : > { %1258 = vrot.lane.b32.xlu1 %v2289_v41, %s1969_s9 }
 0x43b   : > { %1262 = vrot.lane.b32.xlu0 %v2305_v51, %s1969_s9 }
 0x43c   : > { %v1013_v4 = vpop.permute.xlu2 %1012 }
 0x441   : > { %1264 = vrot.lane.b32.xlu1 %v2310_v52, %s1969_s9 }
 0x443   : > { %1478 = vrot.lane.b32.xlu0 %v2210_v62, %s1971_s10 }
 0x446   : > { %v2454_v14 = vpop.permute.xlu2 %1256 }
 0x449   : > { %1474 = vrot.lane.b32.xlu1 %v2215_v3, %s1971_s10 }
 0x44b   : > { %v997_v61 = vpop.permute.xlu1 %996  ;;  %1476 = vrot.lane.b32.xlu0 %v2205_v60, %s1971_s10 }
 0x44d   : > { %v1237_v24 = vpop.permute.xlu0 %1236 }
 0x451   : > { %1484 = vrot.lane.b32.xlu1 %v2218_v5, %s1971_s10 }
 0x453   : > { %v999_v25 = vpop.permute.xlu1 %998  ;;  %1472 = vrot.lane.b32.xlu0 %v2212_v2, %s1971_s10 }
 0x455   : > { %v1001_v27 = vpop.permute.xlu0 %1000 }
 0x456   : > { %v1044_v5 = vrot.slane %v1001_v27, 4 }
 0x458   : > { %v1045_v35 = vsel %vm803_vm11, %v1044_v5, %v997_v61  ;;  %v2464_v5 = vpop.permute.xlu2 %1254 }
 0x459   : > { %1494 = vrot.lane.b32.xlu1 %v2268_v22, %s1971_s10  ;;  %v1049_v38 = vperm.slane %v1045_v35, %v2222_v6 }
 0x45b   : > { %v2402_v62 = vpop.permute.xlu1 %1238  ;;  %1498 = vrot.lane.b32.xlu0 %v2318_v56, %s1971_s10  ;;  %v1058_v19 = vrot.slane %v1049_v38, 4 }
 0x45d   : > { %v1241_v3 = vpop.permute.xlu0 %1240 }
 0x45e   : > { %v1288_v32 = vrot.slane %v1241_v3, 4 }
 0x460   : > { %v2407_v60 = vsel %vm803_vm11, %v1288_v32, %v1237_v24 }
 0x461   : > { %1492 = vrot.lane.b32.xlu1 %v2263_v21, %s1971_s10 }
 0x463   : > { %v1003_v33 = vpop.permute.xlu1 %1002  ;;  %1502 = vrot.lane.b32.xlu0 %v2310_v52, %s1971_s10 }
 0x464   : > { %v1050_v2 = vrot.slane %v1003_v33, 4 }
 0x465   : > { %v1005_v22 = vpop.permute.xlu0 %1004 }
 0x466   : > { %v1051_v36 = vsel %vm803_vm11, %v1050_v2, %v999_v25 }
 0x467   : > { %v1055_v37 = vperm.slane %v1051_v36, %v2222_v6  ;;  %v1293_v36 = vperm.slane %v2407_v60, %v2222_v6 }
 0x469   : > { %v1056_v40 = vrot.slane %v1055_v37, 4  ;;  %1488 = vrot.lane.b32.xlu1 %v2253_v16, %s1971_s10  ;;  %v1059_v61 = vsel %vm803_vm11, %v1055_v37, %v1058_v19 }
 0x46a   : > { %v1067_v32 = vperm.slane %v1059_v61, %v2247_v11 }
 0x46b   : > { %v1057_v21 = vsel %vm803_vm11, %v1056_v40, %v1049_v38  ;;  %v1007_v42 = vpop.permute.xlu1 %1006  ;;  %1496 = vrot.lane.b32.xlu0 %v2289_v41, %s1971_s10  ;;  %v1282_v38 = vrot.slane %v2402_v62, 4 }
 0x46c   : > { %v1063_v43 = vperm.slane %v1057_v21, %v2247_v11 }
 0x46d   : > { %v2423_v45 = vpop.permute.xlu0 %1244 }
 0x46e   : > { %1160 = vst [vmem:[#allocation1] ss:$2 sm:$0xff] %v1063_v43  ;;  %v1068_v9 = vrot.slane %v1063_v43, 4 }
 0x470   : > { %v1069_v15 = vsel %vm803_vm11, 0.0, %v1068_v9 }
 0x471   : > { %962 = vrot.lane.b32.xlu1 %v2326_v63, %s1973_s13 }
 0x473   : > { %v2427_v47 = vpop.permute.xlu1 %1248  ;;  %981 = vrot.lane.b32.xlu0 %v979_v44, %s1974_s14 }
 0x474   : > { %v1316_v40 = vrot.slane %v2427_v47, 4 }
 0x475   : > { %v1009_v16 = vpop.permute.xlu0 %1008 }
 0x476   : > { %v1072_v50 = vrot.slane %v1009_v16, 4  ;;  %v1294_v16 = vrot.slane %v1293_v36, 4  ;;  %v1317_v62 = vsel %vm803_vm11, %v1316_v40, %v2423_v45 }
 0x478   : > { %v1073_v53 = vsel %vm803_vm11, %v1072_v50, %v1005_v22 }
 0x479   : > { %964 = vrot.lane.b32.xlu1 %v961_v20, %s1973_s13  ;;  %v1077_v56 = vperm.slane %v1073_v53, %v2222_v6 }
 0x47b   : > { %v1015_v41 = vpop.permute.xlu1 %1014  ;;  %983 = vrot.lane.b32.xlu0 %v980_v48, %s1974_s14  ;;  %v1086_v20 = vrot.slane %v1077_v56, 4  ;;  %v1070_v48 = vrot.slane %v1067_v32, 4 }
 0x47d   : > { %v1011_v51 = vpop.permute.xlu0 %1010 }
 0x47e   : > { %v1078_v52 = vrot.slane %v1011_v51, 4  ;;  %v1310_v51 = vrot.slane %v2432_v49, 4 }
 0x480   : > { %v1079_v54 = vsel %vm803_vm11, %v1078_v52, %v1007_v42 }
 0x481   : > { %v1083_v55 = vperm.slane %v1079_v54, %v2222_v6 }
 0x483   : > { %v1084_v57 = vrot.slane %v1083_v55, 4  ;;  %v1019_v58 = vpop.permute.xlu1 %1018  ;;  %v1087_v25 = vsel %vm803_vm11, %v1083_v55, %v1086_v20 }
 0x484   : > { %v1106_v59 = vrot.slane %v1019_v58, 4  ;;  %v1095_v33 = vperm.slane %v1087_v25, %v2247_v11 }
 0x485   : > { %v1085_v63 = vsel %vm803_vm11, %v1084_v57, %v1077_v56  ;;  %v1017_v0 = vpop.permute.xlu0 %1016  ;;  %v1071_v56 = vsel %vm803_vm11, 0.0, %v1070_v48  ;;  %v2487_v57 = vperm.slane %v1317_v62, %v2222_v6 }
 0x486   : > { %v1091_v7 = vperm.slane %v1085_v63, %v2247_v11  ;;  %v1107_v26 = vsel %vm803_vm11, %v1106_v59, %v1015_v41  ;;  %v1100_v34 = vrot.slane %v1017_v0, 4  ;;  %v1098_v47 = vrot.slane %v1095_v33, 4  ;;  %v1251_v59 = vpop.permute.xlu2 %1250 }
 0x487   : > { %v2442_v31 = vperm.slane %v1107_v26, %v2222_v6  ;;  %v1322_v26 = vrot.slane %v2487_v57, 4 }
 0x488   : > { %1162 = vst [vmem:[#allocation1 + $0x1] ss:$2 sm:$0xff] %v1091_v7  ;;  %v1101_v46 = vsel %vm803_vm11, %v1100_v34, %v1013_v4  ;;  %v1096_v13 = vrot.slane %v1091_v7, 4  ;;  %v1099_v45 = vsel %vm803_vm11, 0.0, %v1098_v47 }
 0x489   : > { %v1112_v1 = vrot.slane %v2442_v31, 4  ;;  %v2447_v28 = vperm.slane %v1101_v46, %v2222_v6 }
 0x48a   : > { %v1097_v18 = vsel %vm803_vm11, 0.0, %v1096_v13 }
 0x48b   : > { %v1113_v10 = vsel %vm803_vm11, %v1112_v1, %v2447_v28  ;;  %v1021_v12 = vpop.permute.xlu1 %1020 }
 0x48c   : > { %v2452_v29 = vperm.slane %v1113_v10, %v2247_v11  ;;  %v1114_v10 = vrot.slane %v2447_v28, 4 }
 0x48d   : > { %v1025_v8 = vpop.permute.xlu0 %1024 }
 0x48e   : > { %1164 = vst [vmem:[#allocation1 + $0x10] ss:$2 sm:$0xff] %v2452_v29  ;;  %v1128_v24 = vrot.slane %v1025_v8, 4  ;;  %v1124_v63 = vrot.slane %v2452_v29, 4  ;;  %v1487_v19 = vpop.permute.xlu2 %1486  ;;  %v1115_v20 = vsel %vm803_vm11, %v2442_v31, %v1114_v10 }
 0x48f   : > { %v2458_v17 = vld.sshfl [vmem:[#allocation1] sm:$0xff pattern:$0x75316420]  ;;  %v1123_v61 = vperm.slane %v1115_v20, %v2247_v11 }
 0x490   : > { %1175 = vst [vmem:[#allocation1] ss:$2 sm:$0xff] %v1069_v15  ;;  %v1129_v22 = vsel %vm803_vm11, %v1128_v24, %v1021_v12  ;;  %v1125_v46 = vsel %vm803_vm11, 0.0, %v1124_v63  ;;  %v1554_v63 = vrot.slane %v1487_v19, 4 }
 0x491   : > { %1177 = vst [vmem:[#allocation1 + $0x1] ss:$2 sm:$0xff] %v1097_v18  ;;  %v1133_v21 = vperm.slane %v1129_v22, %v2222_v6 }
 0x493   : > { %v1023_v23 = vpop.permute.xlu1 %1022  ;;  %v1142_v15 = vrot.slane %v1133_v21, 4 }
 0x495   : > { %v1027_v27 = vpop.permute.xlu0 %1026 }
 0x496   : > { %v1134_v3 = vrot.slane %v1027_v27, 4 }
 0x498   : > { %v1182_v2 = vld.sshfl [vmem:[#allocation1] sm:$0xff pattern:$0x75316420]  ;;  %v1135_v35 = vsel %vm803_vm11, %v1134_v3, %v1023_v23 }
 0x499   : > { %1194 = vst [vmem:[#allocation1] ss:$2 sm:$0xff] %v1067_v32  ;;  %v1139_v37 = vperm.slane %v1135_v35, %v2222_v6  ;;  %1184 = vrot.lane.b32.xlu2 %v1182_v2, %s1972_s12  ;;  %v1344_v32 = vrot.slane %v2454_v14, 4  ;;  %v1483_v14 = vpop.permute.xlu2 %1482 }
 0x49a   : > { %1196 = vst [vmem:[#allocation1 + $0x1] ss:$2 sm:$0xff] %v1095_v33 }
 0x49b   : > { %v1140_v42 = vrot.slane %v1139_v37, 4  ;;  %v1235_v43 = vpop.permute.xlu1 %1234  ;;  %v1143_v28 = vsel %vm803_vm11, %v1139_v37, %v1142_v15  ;;  %v1126_v37 = vrot.slane %v1123_v61, 4 }
 0x49c   : > { %v1283_v44 = vsel %vm803_vm11, %v1282_v38, %v1235_v43  ;;  %v1151_v25 = vperm.slane %v1143_v28, %v2247_v11 }
 0x49d   : > { %v1141_v60 = vsel %vm803_vm11, %v1140_v42, %v1133_v21  ;;  %v1287_v41 = vperm.slane %v1283_v44, %v2222_v6  ;;  %v1243_v50 = vpop.permute.xlu0 %1242 }
 0x49e   : > { %v1147_v52 = vperm.slane %v1141_v60, %v2247_v11  ;;  %v1311_v55 = vsel %vm803_vm11, %v1310_v51, %v1243_v50  ;;  %v1154_v21 = vrot.slane %v1151_v25, 4 }
 0x49f   : > { %v1295_v53 = vsel %vm803_vm11, %v1294_v16, %v1287_v41  ;;  %v1296_v54 = vrot.slane %v1287_v41, 4  ;;  %v1315_v0 = vperm.slane %v1311_v55, %v2222_v6  ;;  %v1338_v16 = vrot.slane %v2464_v5, 4 }
 0x4a0   : > { %1166 = vst [vmem:[#allocation1 + $0x11] ss:$2 sm:$0xff] %v1147_v52  ;;  %v1152_v7 = vrot.slane %v1147_v52, 4  ;;  %v1301_v13 = vperm.slane %v1295_v53, %v2247_v11  ;;  %v1127_v41 = vsel %vm803_vm11, 0.0, %v1126_v37  ;;  %v1155_v62 = vsel %vm803_vm11, 0.0, %v1154_v21  ;;  %v1711_v37 = vld [vmem:[%s2731_s3 + $0x8] sm:$0xff] }
 0x4a1   : > { %v1201_v58 = vld.sshfl [vmem:[#allocation1] sm:$0xff pattern:$0x75316420]  ;;  %v2490_v49 = vsel %vm803_vm11, %v1293_v36, %v1296_v54  ;;  %v1323_v9 = vsel %vm803_vm11, %v1322_v26, %v1315_v0  ;;  %v1324_v38 = vrot.slane %v1315_v0, 4  ;;  %v1339_v60 = vsel %vm803_vm11, %v1338_v16, %v1251_v59 }
 0x4a2   : > { %1213 = vst [vmem:[#allocation1] ss:$2 sm:$0xff] %v1071_v56  ;;  %1203 = vrot.lane.b32.xlu1 %v1201_v58, %s1973_s13  ;;  %v1153_v12 = vsel %vm803_vm11, 0.0, %v1152_v7  ;;  %v1329_v8 = vperm.slane %v1323_v9, %v2247_v11  ;;  %v1306_v3 = vrot.slane %v1301_v13, 4  ;;  %v1305_v5 = vperm.slane %v2490_v49, %v2247_v11 }
 0x4a3   : > { %1215 = vst [vmem:[#allocation1 + $0x1] ss:$2 sm:$0xff] %v1099_v45  ;;  %v1261_v4 = vpop.permute.xlu1 %1260  ;;  %v1325_v51 = vsel %vm803_vm11, %v2487_v57, %v1324_v38  ;;  %v2538_v55 = vperm.slane %v1339_v60, %v2222_v6  ;;  %v1555_v26 = vsel %vm803_vm11, %v1554_v63, %v1483_v14  ;;  %v1710_v60 = vld [vmem:[%s2731_s3] sm:$0xff] }
 0x4a4   : > { %v1334_v24 = vrot.slane %v1329_v8, 4  ;;  %v1307_v35 = vsel %vm803_vm11, 0.0, %v1306_v3  ;;  %v1333_v56 = vperm.slane %v1325_v51, %v2247_v11 }
 0x4a5   : > { %v1253_v34 = vpop.permute.xlu0 %1252  ;;  %v1352_v51 = vrot.slane %v2538_v55, 4 }
 0x4a6   : > { %v1335_v33 = vsel %vm803_vm11, 0.0, %v1334_v24  ;;  %v1345_v2 = vsel %vm803_vm11, %v1344_v32, %v1253_v34  ;;  %v1308_v34 = vrot.slane %v1305_v5, 4  ;;  %v1336_v10 = vrot.slane %v1333_v56, 4 }
 0x4a7   : > { %v2498_v1 = vld.sshfl [vmem:[#allocation1 + $0x10] sm:$0xff pattern:$0x75316420]  ;;  %v2519_v42 = vperm.slane %v1345_v2, %v2222_v6 }
 0x4a8   : > { %1179 = vst [vmem:[#allocation1 + $0x10] ss:$2 sm:$0xff] %v1125_v46  ;;  %v1309_v19 = vsel %vm803_vm11, 0.0, %v1308_v34 }
 0x4a9   : > { %1181 = vst [vmem:[#allocation1 + $0x11] ss:$2 sm:$0xff] %v1153_v12  ;;  %v1350_v47 = vrot.slane %v2519_v42, 4 }
 0x4aa   : > { %v1220_v29 = vld.sshfl [vmem:[#allocation1] sm:$0xff pattern:$0x75316420] }
 0x4ab   : > { %1398 = vst [vmem:[#allocation1] ss:$2 sm:$0xff] %v1301_v13  ;;  %1222 = vrot.lane.b32.xlu0 %v1220_v29, %s1974_s14  ;;  %v1259_v18 = vpop.permute.xlu1 %1258  ;;  %v1351_v45 = vsel %vm803_vm11, %v1350_v47, %v2538_v55 }
 0x4ac   : > { %1400 = vst [vmem:[#allocation1 + $0x1] ss:$2 sm:$0xff] %v1329_v8  ;;  %v1357_v46 = vperm.slane %v1351_v45, %v2247_v11  ;;  %v2558_v8 = vperm.slane %v1555_v26, %v2222_v6 }
 0x4ad   : > { %v1263_v23 = vpop.permute.xlu0 %1262 }
 0x4ae   : > { %v1366_v43 = vrot.slane %v1263_v23, 4  ;;  %v1337_v23 = vsel %vm803_vm11, 0.0, %v1336_v10  ;;  %v1560_v2 = vrot.slane %v2558_v8, 4 }
 0x4b0   : > { %v1183_v27 = vld.sshfl [vmem:[#allocation1 + $0x10] sm:$0xff pattern:$0x75316420]  ;;  %v1367_v52 = vsel %vm803_vm11, %v1366_v43, %v1259_v18 }
 0x4b1   : > { %1198 = vst [vmem:[#allocation1 + $0x10] ss:$2 sm:$0xff] %v1123_v61  ;;  %1186 = vrot.lane.b32.xlu2 %v1183_v27, %s1972_s12  ;;  %v2542_v58 = vperm.slane %v1367_v52, %v2222_v6  ;;  %v1353_v52 = vsel %vm803_vm11, %v2519_v42, %v1352_v51 }
 0x4b2   : > { %1200 = vst [vmem:[#allocation1 + $0x11] ss:$2 sm:$0xff] %v1151_v25 }
 0x4b3   : > { %v2514_v31 = vld.sshfl [vmem:[#allocation1] sm:$0xff pattern:$0x75316420]  ;;  %v1265_v22 = vpop.permute.xlu1 %1264 }
 0x4b4   : > { %1415 = vst [vmem:[#allocation1 + $0x1] ss:$2 sm:$0xff] %v1335_v33  ;;  %v1372_v36 = vrot.slane %v1265_v22, 4  ;;  %v1713_v33 = vld [vmem:[%s2731_s3 + $0x18] sm:$0xff]  ;;  %v1362_v22 = vrot.slane %v1357_v46, 4 }
 0x4b5   : > { %1413 = vst [vmem:[#allocation1] ss:$2 sm:$0xff] %v1307_v35  ;;  %v1479_v40 = vpop.permute.xlu0 %1478  ;;  %1754 = vmatpush.msra.mxu3 %v1713_v33  ;;  %v1712_v35 = vld [vmem:[%s2731_s3 + $0x10] sm:$0xff] }
 0x4b6   : > { %v1373_v44 = vsel %vm803_vm11, %v1372_v36, %v1261_v4  ;;  %v1526_v49 = vrot.slane %v1479_v40, 4  ;;  %v1481_v4 = vpop.permute.xlu2 %1480 }
 0x4b7   : > { %v2524_v48 = vperm.slane %v1373_v44, %v2222_v6  ;;  %1755 = vmatpush.msra.mxu3 %v1712_v35  ;;  %v1363_v44 = vsel %vm803_vm11, 0.0, %v1362_v22 }
 0x4b9   : > { %v1202_v50 = vld.sshfl [vmem:[#allocation1 + $0x10] sm:$0xff pattern:$0x75316420]  ;;  %v1378_v53 = vrot.slane %v2524_v48, 4  ;;  %1756 = vmatpush.msra.mxu3 %v1711_v37 }
 0x4ba   : > { %1217 = vst [vmem:[#allocation1 + $0x10] ss:$2 sm:$0xff] %v1127_v41  ;;  %1205 = vrot.lane.b32.xlu1 %v1202_v50, %s1973_s13 }
 0x4bb   : > { %1219 = vst [vmem:[#allocation1 + $0x11] ss:$2 sm:$0xff] %v1155_v62  ;;  %v1475_v54 = vpop.permute.xlu1 %1474  ;;  %v1379_v0 = vsel %vm803_vm11, %v1378_v53, %v2542_v58  ;;  %1757 = vmatpush.msra.mxu3 %v1710_v60  ;;  %v1380_v62 = vrot.slane %v2542_v58, 4  ;;  %v1361_v53 = vperm.slane %v1353_v52, %v2247_v11 }
 0x4bc   : > { %v1420_v57 = vld.sshfl [vmem:[#allocation1] sm:$0xff pattern:$0x75316420]  ;;  %v1527_v7 = vsel %vm803_vm11, %v1526_v49, %v1475_v54  ;;  %v1385_v12 = vperm.slane %v1379_v0, %v2247_v11 }
 0x4bd   : > { %1422 = vrot.lane.b32.xlu2 %v1420_v57, %s1972_s12  ;;  %1432 = vst [vmem:[#allocation1] ss:$2 sm:$0xff] %v1305_v5  ;;  %v1477_v59 = vpop.permute.xlu0 %1476  ;;  %v2554_v13 = vperm.slane %v1527_v7, %v2222_v6  ;;  %v1381_v5 = vsel %vm803_vm11, %v2524_v48, %v1380_v62  ;;  %v1364_v7 = vrot.slane %v1361_v53, 4 }
 0x4be   : > { %1434 = vst [vmem:[#allocation1 + $0x1] ss:$2 sm:$0xff] %v1333_v56  ;;  %v1520_v15 = vrot.slane %v1477_v59, 4  ;;  %v1390_v25 = vrot.slane %v1385_v12, 4  ;;  %v1491_v38 = vpop.permute.xlu2 %1490  ;;  %v1389_v55 = vperm.slane %v1381_v5, %v2247_v11 }
 0x4bf   : > { %v1532_v27 = vrot.slane %v2554_v13, 4 }
 0x4c0   : > { %v1391_v14 = vsel %vm803_vm11, 0.0, %v1390_v25 }
 0x4c2   : > { %v1221_v9 = vld.sshfl [vmem:[#allocation1 + $0x10] sm:$0xff pattern:$0x75316420] }
 0x4c3   : > { %1402 = vst [vmem:[#allocation1 + $0x10] ss:$2 sm:$0xff] %v1357_v46  ;;  %1224 = vrot.lane.b32.xlu0 %v1221_v9, %s1974_s14  ;;  %v1485_v29 = vpop.permute.xlu1 %1484  ;;  %v1392_v46 = vrot.slane %v1389_v55, 4 }
 0x4c4   : > { %1404 = vst [vmem:[#allocation1 + $0x11] ss:$2 sm:$0xff] %v1385_v12  ;;  %v1548_v18 = vrot.slane %v1485_v29, 4 }
 0x4c5   : > { %v1439_v20 = vld.sshfl [vmem:[#allocation1] sm:$0xff pattern:$0x75316420]  ;;  %v1473_v28 = vpop.permute.xlu0 %1472 }
 0x4c6   : > { %1441 = vrot.lane.b32.xlu1 %v1439_v20, %s1973_s13  ;;  %1451 = vst [vmem:[#allocation1] ss:$2 sm:$0xff] %v1309_v19  ;;  %v1549_v61 = vsel %vm803_vm11, %v1548_v18, %v1481_v4  ;;  %v1521_v24 = vsel %vm803_vm11, %v1520_v15, %v1473_v28  ;;  %v1501_v57 = vpop.permute.xlu2 %1500  ;;  %v1365_v20 = vsel %vm803_vm11, 0.0, %v1364_v7 }
 0x4c7   : > { %1453 = vst [vmem:[#allocation1 + $0x1] ss:$2 sm:$0xff] %v1337_v23  ;;  %v2567_v3 = vperm.slane %v1549_v61, %v2222_v6  ;;  %v2570_v32 = vperm.slane %v1521_v24, %v2222_v6  ;;  %v1604_v18 = vrot.slane %v1501_v57, 4 }
 0x4c9   : > { %v1533_v36 = vsel %vm803_vm11, %v1532_v27, %v2570_v32  ;;  %v1561_v40 = vsel %vm803_vm11, %v1560_v2, %v2567_v3  ;;  %v1534_v34 = vrot.slane %v2570_v32, 4  ;;  %v1562_v9 = vrot.slane %v2567_v3, 4 }
 0x4ca   : > { %v1539_v16 = vperm.slane %v1533_v36, %v2247_v11  ;;  %v1567_v41 = vperm.slane %v1561_v40, %v2247_v11  ;;  %v1393_v27 = vsel %vm803_vm11, 0.0, %v1392_v46 }
 0x4cb   : > { %v2587_v21 = vld.sshfl [vmem:[#allocation1 + $0x10] sm:$0xff pattern:$0x75316420]  ;;  %v1495_v43 = vpop.permute.xlu1 %1494  ;;  %v1535_v28 = vsel %vm803_vm11, %v2554_v13, %v1534_v34  ;;  %v1563_v3 = vsel %vm803_vm11, %v2558_v8, %v1562_v9 }
 0x4cc   : > { %1419 = vst [vmem:[#allocation1 + $0x11] ss:$2 sm:$0xff] %v1391_v14  ;;  %v1582_v54 = vrot.slane %v1495_v43, 4  ;;  %v1544_v59 = vrot.slane %v1539_v16, 4  ;;  %v1572_v45 = vrot.slane %v1567_v41, 4  ;;  %v1543_v22 = vperm.slane %v1535_v28, %v2247_v11 }
 0x4cd   : > { %1417 = vst [vmem:[#allocation1 + $0x10] ss:$2 sm:$0xff] %v1363_v44  ;;  %v1499_v50 = vpop.permute.xlu0 %1498  ;;  %v1571_v36 = vperm.slane %v1563_v3, %v2247_v11 }
 0x4ce   : > { %v1458_v47 = vld.sshfl [vmem:[#allocation1] sm:$0xff pattern:$0x75316420]  ;;  %v1583_v63 = vsel %vm803_vm11, %v1582_v54, %v1491_v38  ;;  %v1545_v48 = vsel %vm803_vm11, 0.0, %v1544_v59  ;;  %v1573_v26 = vsel %vm803_vm11, 0.0, %v1572_v45  ;;  %v944_v25 = vpop.permute.xlu2 %943 }
 0x4cf   : > { %1460 = vrot.lane.b32.xlu0 %v1458_v47, %s1974_s14  ;;  %1636 = vst [vmem:[#allocation1] ss:$2 sm:$0xff] %v1539_v16  ;;  %v2614_v10 = vperm.slane %v1583_v63, %v2222_v6  ;;  %v1546_v16 = vrot.slane %v1543_v22, 4 }
 0x4d0   : > { %1638 = vst [vmem:[#allocation1 + $0x1] ss:$2 sm:$0xff] %v1567_v41 }
 0x4d1   : > { %v1588_v32 = vrot.slane %v2614_v10, 4  ;;  %v1547_v62 = vsel %vm803_vm11, 0.0, %v1546_v16 }
 0x4d3   : > { %v1493_v56 = vpop.permute.xlu1 %1492 }
 0x4d4   : > { %v1421_v58 = vld.sshfl [vmem:[#allocation1 + $0x10] sm:$0xff pattern:$0x75316420]  ;;  %v1576_v12 = vrot.slane %v1493_v56, 4 }
 0x4d5   : > { %1424 = vrot.lane.b32.xlu2 %v1421_v58, %s1972_s12  ;;  %1436 = vst [vmem:[#allocation1 + $0x10] ss:$2 sm:$0xff] %v1361_v53  ;;  %v1503_v42 = vpop.permute.xlu0 %1502 }
 0x4d6   : > { %1438 = vst [vmem:[#allocation1 + $0x11] ss:$2 sm:$0xff] %v1389_v55  ;;  %v1610_v49 = vrot.slane %v1503_v42, 4  ;;  %v946_v51 = vpop.permute.xlu2 %945 }
 0x4d7   : > { %v2608_v4 = vld.sshfl [vmem:[#allocation1] sm:$0xff pattern:$0x75316420]  ;;  %v989_v47 = vsel %vm987_vm12, %v2346_v39, %v946_v51 }
 0x4d8   : > { %v1611_v0 = vsel %vm803_vm11, %v1610_v49, %v1499_v50  ;;  %1651 = vst [vmem:[#allocation1] ss:$2 sm:$0xff] %v1545_v48  ;;  %v1574_v50 = vrot.slane %v1571_v36, 4 }
 0x4d9   : > { %1653 = vst [vmem:[#allocation1 + $0x1] ss:$2 sm:$0xff] %v1573_v26  ;;  %v2617_v29 = vperm.slane %v1611_v0, %v2222_v6 }
 0x4da   : > { %v1575_v52 = vsel %vm803_vm11, 0.0, %v1574_v50 }
 0x4db   : > { %v1489_v15 = vpop.permute.xlu1 %1488  ;;  %v1616_v2 = vrot.slane %v2617_v29, 4 }
 0x4dc   : > { %v1577_v19 = vsel %vm803_vm11, %v1576_v12, %v1489_v15 }
 0x4dd   : > { %v1440_v23 = vld.sshfl [vmem:[#allocation1 + $0x10] sm:$0xff pattern:$0x75316420]  ;;  %v1581_v61 = vperm.slane %v1577_v19, %v2222_v6  ;;  %v1497_v24 = vpop.permute.xlu0 %1496 }
 0x4de   : > { %1443 = vrot.lane.b32.xlu1 %v1440_v23, %s1973_s13  ;;  %1455 = vst [vmem:[#allocation1 + $0x10] ss:$2 sm:$0xff] %v1365_v20  ;;  %v1605_v33 = vsel %vm803_vm11, %v1604_v18, %v1497_v24 }
 0x4df   : > { %1457 = vst [vmem:[#allocation1 + $0x11] ss:$2 sm:$0xff] %v1393_v27  ;;  %v1609_v13 = vperm.slane %v1605_v33, %v2222_v6  ;;  %v1589_v35 = vsel %vm803_vm11, %v1588_v32, %v1581_v61  ;;  %v988_v6 = vsel %vm987_vm12, %v2279_v30, %v944_v25  ;;  %v1590_v39 = vrot.slane %v1581_v61, 4 }
 0x4e0   : > { %v1658_v8 = vld.sshfl [vmem:[#allocation1] sm:$0xff pattern:$0x75316420]  ;;  %v1595_v38 = vperm.slane %v1589_v35, %v2247_v11 }
 0x4e1   : > { %v1617_v37 = vsel %vm803_vm11, %v1616_v2, %v1609_v13  ;;  %1660 = vrot.lane.b32.xlu2 %v1658_v8, %s1972_s12  ;;  %1670 = vst [vmem:[#allocation1] ss:$2 sm:$0xff] %v1543_v22  ;;  %v1618_v42 = vrot.slane %v1609_v13, 4  ;;  %v1591_v63 = vsel %vm803_vm11, %v2614_v10, %v1590_v39 }
 0x4e2   : > { %1672 = vst [vmem:[#allocation1 + $0x1] ss:$2 sm:$0xff] %v1571_v36  ;;  %v1623_v14 = vperm.slane %v1617_v37, %v2247_v11  ;;  %v1600_v5 = vrot.slane %v1595_v38, 4  ;;  %v1599_v0 = vperm.slane %v1591_v63, %v2247_v11 }
 0x4e3   : > { %v963_v40 = vpop.permute.xlu1 %962  ;;  %v1619_v48 = vsel %vm803_vm11, %v2617_v29, %v1618_v42 }
 0x4e4   : > { %v991_v43 = vsel %vm990_vm13, %v988_v6, %v963_v40  ;;  %v1628_v54 = vrot.slane %v1623_v14, 4  ;;  %v1601_v59 = vsel %vm803_vm11, 0.0, %v1600_v5  ;;  %v1627_v7 = vperm.slane %v1619_v48, %v2247_v11 }
 0x4e5   : > { %v982_v44 = vpop.permute.xlu0 %981  ;;  %v1602_v34 = vrot.slane %v1599_v0, 4 }
 0x4e6   : > { %v1459_v60 = vld.sshfl [vmem:[#allocation1 + $0x10] sm:$0xff pattern:$0x75316420]  ;;  %v994_v41 = vsel %vm993_vm14, %v991_v43, %v982_v44  ;;  %v1629_v45 = vsel %vm803_vm11, 0.0, %v1628_v54  ;;  %v1630_v46 = vrot.slane %v1627_v7, 4 }
 0x4e7   : > { %1462 = vrot.lane.b32.xlu0 %v1459_v60, %s1974_s14  ;;  %1640 = vst [vmem:[#allocation1 + $0x10] ss:$2 sm:$0xff] %v1595_v38  ;;  %1879 = vmatmul.msk.f32.vlgmr.msra.gmra.mxu3 %vm295_vm0, %v994_v41  ;;  %v1603_v9 = vsel %vm803_vm11, 0.0, %v1602_v34 }
 0x4e8   : > { %1642 = vst [vmem:[#allocation1 + $0x11] ss:$2 sm:$0xff] %v1623_v14  ;;  %v1631_v10 = vsel %vm803_vm11, 0.0, %v1630_v46 }
 0x4e9   : > { %v1677_v30 = vld.sshfl [vmem:[#allocation1] sm:$0xff pattern:$0x75316420] }
 0x4ea   : > { %1679 = vrot.lane.b32.xlu1 %v1677_v30, %s1973_s13  ;;  %1689 = vst [vmem:[#allocation1] ss:$2 sm:$0xff] %v1547_v62 }
 0x4eb   : > { %v965_v53 = vpop.permute.xlu1 %964  ;;  %1691 = vst [vmem:[#allocation1 + $0x1] ss:$2 sm:$0xff] %v1575_v52 }
 0x4ec   : > { %v992_v56 = vsel %vm990_vm13, %v989_v47, %v965_v53 }
 0x4ed   : > { %v984_v57 = vpop.permute.xlu0 %983 }
 0x4ee   : > { %v995_v55 = vsel %vm993_vm14, %v992_v56, %v984_v57 }
 0x4ef   : > { %1880 = vmatmul.msk.f32.gmra.mxu3 %vm295_vm0, %v995_v55  ;;  %v2654_v58 = vld.sshfl [vmem:[#allocation1 + $0x10] sm:$0xff pattern:$0x75316420] }
 0x4f0   : > { %1655 = vst [vmem:[#allocation1 + $0x10] ss:$2 sm:$0xff] %v1601_v59 }
 0x4f1   : > { %1657 = vst [vmem:[#allocation1 + $0x11] ss:$2 sm:$0xff] %v1629_v45 }
 0x4f2   : > { %v1696_v49 = vld.sshfl [vmem:[#allocation1] sm:$0xff pattern:$0x75316420] }
 0x4f3   : > { %1698 = vrot.lane.b32.xlu0 %v1696_v49, %s1974_s14  ;;  %v1185_v11 = vpop.permute.xlu2 %1184 }
 0x4f4   : > { %v1228_v18 = vsel %vm987_vm12, %v2458_v17, %v1185_v11 }
 0x4f8   : > { %v1659_v26 = vld.sshfl [vmem:[#allocation1 + $0x10] sm:$0xff pattern:$0x75316420] }
 0x4f9   : > { %1662 = vrot.lane.b32.xlu2 %v1659_v26, %s1972_s12  ;;  %1674 = vst [vmem:[#allocation1 + $0x10] ss:$2 sm:$0xff] %v1599_v0 }
 0x4fa   : > { %1676 = vst [vmem:[#allocation1 + $0x11] ss:$2 sm:$0xff] %v1627_v7 }
 0x501   : > { %v1678_v12 = vld.sshfl [vmem:[#allocation1 + $0x10] sm:$0xff pattern:$0x75316420] }
 0x502   : > { %1681 = vrot.lane.b32.xlu1 %v1678_v12, %s1973_s13  ;;  %1693 = vst [vmem:[#allocation1 + $0x10] ss:$2 sm:$0xff] %v1603_v9 }
 0x503   : > { %1695 = vst [vmem:[#allocation1 + $0x11] ss:$2 sm:$0xff] %v1631_v10 }
 0x50a   : > { %v1697_v29 = vld.sshfl [vmem:[#allocation1 + $0x10] sm:$0xff pattern:$0x75316420] }
 0x50b   : > { %1700 = vrot.lane.b32.xlu0 %v1697_v29, %s1974_s14  ;;  %v1187_v23 = vpop.permute.xlu2 %1186 }
 0x50c   : > { %v1229_v24 = vsel %vm987_vm12, %v2498_v1, %v1187_v23 }
 0x514   : > { %v1204_v15 = vpop.permute.xlu1 %1203 }
 0x515   : > { %v1230_v19 = vsel %vm990_vm13, %v1228_v18, %v1204_v15 }
 0x517   : > { %v1423_v17 = vpop.permute.xlu2 %1422 }
 0x518   : > { %v1466_v33 = vsel %vm987_vm12, %v2514_v31, %v1423_v17 }
 0x51d   : > { %v1223_v20 = vpop.permute.xlu0 %1222 }
 0x51e   : > { %v1232_v28 = vsel %vm993_vm14, %v1230_v19, %v1223_v20 }
 0x51f   : > { %1881 = vmatmul.msk.f32.gmra.mxu3 %vm295_vm0, %v1232_v28 }
 0x52c   : > { %v1206_v61 = vpop.permute.xlu1 %1205 }
 0x52d   : > { %v1231_v25 = vsel %vm990_vm13, %v1229_v24, %v1206_v61 }
 0x52f   : > { %v1425_v1 = vpop.permute.xlu2 %1424 }
 0x530   : > { %v1467_v36 = vsel %vm987_vm12, %v2587_v21, %v1425_v1  ;;  %v1936_v21 = vld [vmem:[%s2732_s4] ss:$0 sm:$0xff] }
 0x535   : > { %v1225_v27 = vpop.permute.xlu0 %1224 }
 0x536   : > { %v1233_v3 = vsel %vm993_vm14, %v1231_v25, %v1225_v27 }
 0x537   : > { %1882 = vmatmul.msk.f32.gmra.mxu3 %vm295_vm0, %v1233_v3 }
 0x538   : > { %v1442_v32 = vpop.permute.xlu1 %1441 }
 0x539   : > { %v1468_v2 = vsel %vm990_vm13, %v1466_v33, %v1442_v32 }
 0x53b   : > { %v1661_v31 = vpop.permute.xlu2 %1660 }
 0x53c   : > { %v1704_v6 = vsel %vm987_vm12, %v2608_v4, %v1661_v31 }
 0x541   : > { %v1461_v13 = vpop.permute.xlu0 %1460 }
 0x542   : > { %v1470_v22 = vsel %vm993_vm14, %v1468_v2, %v1461_v13 }
 0x543   : > { %1883 = vmatmul.msk.f32.gmra.mxu3 %vm295_vm0, %v1470_v22 }
 0x550   : > { %v1444_v35 = vpop.permute.xlu1 %1443 }
 0x551   : > { %v1469_v8 = vsel %vm990_vm13, %v1467_v36, %v1444_v35 }
 0x553   : > { %v1663_v50 = vpop.permute.xlu2 %1662 }
 0x554   : > { %v1705_v62 = vsel %vm987_vm12, %v2654_v58, %v1663_v50 }
 0x559   : > { %v1463_v37 = vpop.permute.xlu0 %1462 }
 0x55a   : > { %v1471_v38 = vsel %vm993_vm14, %v1469_v8, %v1463_v37 }
 0x55b   : > { %1884 = vmatmul.msk.f32.gmra.mxu3 %vm295_vm0, %v1471_v38 }
 0x55c   : > { %v1680_v40 = vpop.permute.xlu1 %1679 }
 0x55d   : > { %v1706_v14 = vsel %vm990_vm13, %v1704_v6, %v1680_v40 }
 0x565   : > { %v1699_v43 = vpop.permute.xlu0 %1698 }
 0x566   : > { %v1708_v44 = vsel %vm993_vm14, %v1706_v14, %v1699_v43 }
 0x567   : > { %1885 = vmatmul.msk.f32.gmra.mxu3 %vm295_vm0, %v1708_v44 }
 0x56a   : > { %v1759_v4 = vpop.f32.mrf.mxu3 }
 0x56b   : > { %v1760_v16 = vadd.f32 %v1936_v21, %v1759_v4 }
 0x56d   : > { %1783 = vst.msk [vmem:[%s2702_s29] sm:$0xff] %vm295_vm0, %v1760_v16 }
 0x572   : > { %v1762_v60 = vpop.f32.mrf.mxu3 }
 0x573   : > { %v1763_v41 = vadd.f32 %v1936_v21, %v1762_v60 }
 0x574   : > { %v1682_v51 = vpop.permute.xlu1 %1681 }
 0x575   : > { %1784 = vst.msk [vmem:[%s2702_s29 + $0x8] sm:$0xff] %vm295_vm0, %v1763_v41  ;;  %v1707_v30 = vsel %vm990_vm13, %v1705_v62, %v1682_v51 }
 0x57d   : > { %v1701_v47 = vpop.permute.xlu0 %1700 }
 0x57e   : > { %v1709_v52 = vsel %vm993_vm14, %v1707_v30, %v1701_v47 }
 0x57f   : > { %1886 = vmatmul.msk.f32.gmra.mxu3 %vm295_vm0, %v1709_v52 }
 0x5a2   : > { %v1765_v5 = vpop.f32.mrf.mxu3 }
 0x5a3   : > { %v1766_v53 = vadd.f32 %v1936_v21, %v1765_v5 }
 0x5a5   : > { %1785 = vst.msk [vmem:[%s2702_s29 + $0x10] sm:$0xff] %vm295_vm0, %v1766_v53 }
 0x5ba   : > { %v1768_v54 = vpop.f32.mrf.mxu3 }
 0x5bb   : > { %v1769_v56 = vadd.f32 %v1936_v21, %v1768_v54 }
 0x5bd   : > { %1786 = vst.msk [vmem:[%s2702_s29 + $0x18] sm:$0xff] %vm295_vm0, %v1769_v56 }
 0x5c6   : > { %v1771_v57 = vpop.f32.mrf.mxu3 }
 0x5c7   : > { %v1772_v55 = vadd.f32 %v1936_v21, %v1771_v57 }
 0x5c9   : > { %1787 = vst.msk [vmem:[%s2702_s29 + $0x20] sm:$0xff] %vm295_vm0, %v1772_v55 }
 0x5de   : > { %v1774_v59 = vpop.f32.mrf.mxu3 }
 0x5df   : > { %v1775_v58 = vadd.f32 %v1936_v21, %v1774_v59 }
 0x5e1   : > { %1788 = vst.msk [vmem:[%s2702_s29 + $0x28] sm:$0xff] %vm295_vm0, %v1775_v58 }
 0x5ea   : > { %v1777_v39 = vpop.f32.mrf.mxu3 }
 0x5eb   : > { %v1778_v45 = vadd.f32 %v1936_v21, %v1777_v39 }
 0x5ed   : > { %1789 = vst.msk [vmem:[%s2702_s29 + $0x30] sm:$0xff] %vm295_vm0, %v1778_v45 }
 0x602   : > { %v1780_v42 = vpop.f32.mrf.mxu3 }
 0x603   : > { %v1781_v49 = vadd.f32 %v1936_v21, %v1780_v42 }
 0x605   : > { %1790 = vst.msk [vmem:[%s2702_s29 + $0x38] sm:$0xff] %vm295_vm0, %v1781_v49 }
 0x606 PF: > { %s17_s24 = sadd.s32 1, %s1963_s24  }
 0x607   : > { %p14_p4 = scmp.ge.s32.totalorder %s17_s24, 4  }
 0x609   :  { %16 = sbr.rel (!%p14_p4) target bundleno = 1 (0x1), region = 126 }

</bundles_post_ra>
